<compile_context>
chip_gen: v7x
topology: tpu7x:2x2x1
jax: 0.10.0
libtpu: 0.0.40
codegen_flags: <defaults>
</compile_context>

<pallas_src>
import jax
import jax.numpy as jnp
from jax.experimental import pallas as pl
from jax.experimental.pallas import tpu as pltpu


LANE = 128            # pad N up to a multiple of this (lane-dense output)
IN_FEATURES = 3 * 32 * 32
SMALL_B = 128         # no-grid single-shot path cutoff


def _round_up(x, m):
    return ((x + m - 1) // m) * m


def _chip_kind():
    try:
        return jax.devices()[0].device_kind.lower()
    except Exception:
        return ""


def _select_tiling():
    """Per-generation batch tile + scoped-VMEM limit (review feedback)."""
    kind = _chip_kind()
    if "v5" in kind:
        # v5e: scoped-VMEM default is only 16 MiB and HBM is slow enough that
        # per-step overhead at TB=256 is already <10%; stay at 256.
        return 256, None
    if "7" in kind:
        # v7x: ~3.2 TB/s HBM per TC -> per-step overhead dominates at small
        # tiles; TB=1024 needs the scoped limit raised above the 32 MiB
        # default (footprint ~28 MiB double-buffered vs 64 MiB physical).
        return 1024, 40 << 20
    # v6e / unknown: 32 MiB scoped default comfortably holds TB=512.
    return 512, None


TB, VMEM_LIMIT = _select_tiling()


def _linear_kernel(x_ref, w_ref, b_ref, o_ref):
    # x_ref: (tb_or_B, K)  w_ref: (K, Np)  b_ref: (1, Np)  o_ref: (tb_or_B, Np)
    acc = jnp.dot(x_ref[...], w_ref[...], preferred_element_type=jnp.float32)
    o_ref[...] = (acc + b_ref[...]).astype(o_ref.dtype)


def linear_pallas(x_flat, w_t_pad, b_pad, n_classes):
    """x_flat: (B, K) f32, w_t_pad: (K, Np) f32, b_pad: (1, Np) f32 -> (B, n_classes)."""
    B, K = x_flat.shape
    Kw, Np = w_t_pad.shape
    assert K == Kw and b_pad.shape == (1, Np)

    cost = pl.CostEstimate(
        flops=2 * B * K * Np,
        transcendentals=0,
        bytes_accessed=(B * K + K * Np + Np + B * Np) * 4,
    )

    if B <= SMALL_B:
        # Tiny problem: single shot, whole-array blocks resident in VMEM,
        # no grid / pipeline machinery at all.
        out = pl.pallas_call(
            _linear_kernel,
            out_shape=jax.ShapeDtypeStruct((B, Np), x_flat.dtype),
            in_specs=[
                pl.BlockSpec(memory_space=pltpu.MemorySpace.VMEM),
                pl.BlockSpec(memory_space=pltpu.MemorySpace.VMEM),
                pl.BlockSpec(memory_space=pltpu.MemorySpace.VMEM),
            ],
            out_specs=pl.BlockSpec(memory_space=pltpu.MemorySpace.VMEM),
            cost_estimate=cost,
        )(x_flat, w_t_pad, b_pad)
    else:
        # Batch-tiled path: x double-buffered across the grid, weight/bias
        # resident (index_map always (0, 0)), batch axis parallel (megacore).
        if B >= 2 * TB:
            tb = TB
        else:
            # Medium batch: split into (at least) two tiles so both
            # TensorCores participate on v7x.
            tb = min(TB, _round_up(pl.cdiv(B, 2), 8))
        grid = (pl.cdiv(B, tb),)
        out = pl.pallas_call(
            _linear_kernel,
            out_shape=jax.ShapeDtypeStruct((B, Np), x_flat.dtype),
            grid_spec=pl.GridSpec(
                grid=grid,
                in_specs=[
                    pl.BlockSpec((tb, K), lambda i: (i, 0)),
                    # TODO(synk): pipeline_mode=pl.Buffered(1) on the resident
                    # weight/bias would free ~1.5 MiB VMEM; omitted for
                    # lowering compatibility (index_map is constant anyway, so
                    # the second buffer is only a VMEM cost, not a DMA cost).
                    pl.BlockSpec((K, Np), lambda i: (0, 0)),
                    pl.BlockSpec((1, Np), lambda i: (0, 0)),
                ],
                out_specs=pl.BlockSpec((tb, Np), lambda i: (i, 0)),
            ),
            compiler_params=pltpu.CompilerParams(
                dimension_semantics=("parallel",),
                vmem_limit_bytes=VMEM_LIMIT,
            ),
            cost_estimate=cost,
        )(x_flat, w_t_pad, b_pad)

    return out[:, :n_classes]


class TestModelPallas:
    """JAX/Pallas port of TestModel: Flatten + Linear(3*32*32, n_classes)."""

    def __init__(self, n_classes, key):
        in_features = IN_FEATURES
        self.n_classes = n_classes
        kw, kb = jax.random.split(key)
        # PyTorch nn.Linear default init: U(-1/sqrt(in), 1/sqrt(in))
        bound = 1.0 / jnp.sqrt(jnp.float32(in_features))
        # weight stored (out, in) like PyTorch
        self.weight = jax.random.uniform(
            kw, (n_classes, in_features), jnp.float32, -bound, bound
        )
        self.bias = jax.random.uniform(
            kb, (n_classes,), jnp.float32, -bound, bound
        )

        # One-time prep for the kernel: transpose to (K, N) and zero-pad the
        # output dim up to a multiple of 128 lanes; bias pre-reshaped/padded.
        n_pad = max(LANE, _round_up(n_classes, LANE))
        w_t = jnp.transpose(self.weight)  # (K, N)
        self._w_t_pad = jnp.pad(w_t, ((0, 0), (0, n_pad - n_classes)))
        self._b_pad = jnp.pad(self.bias, (0, n_pad - n_classes)).reshape(1, n_pad)

        n_cls = n_classes  # static under jit

        def _fwd(x, w_t_pad, b_pad):
            B = x.shape[0]
            x_flat = x.reshape(B, -1)  # nn.Flatten: keep batch, flatten row-major
            return linear_pallas(x_flat, w_t_pad, b_pad, n_cls)

        # jit so the flatten + epilogue slice fuse with the custom call.
        self._forward = jax.jit(_fwd)

    def __call__(self, x):
        # x: (B, 3, 32, 32) NCHW
        return self._forward(x, self._w_t_pad, self._b_pad)


if __name__ == "__main__":
    key = jax.random.PRNGKey(0)
    k_param, k_x, k_x2, k_x3 = jax.random.split(key, 4)

    n_classes = 10
    model = TestModelPallas(n_classes, k_param)

    # Small-batch (no-grid) path
    batch = 2
    x = jax.random.normal(k_x, (batch, 3, 32, 32), jnp.float32)
    y = jax.block_until_ready(model(x))
    ref = x.reshape(batch, -1) @ model.weight.T + model.bias
    assert y.shape == (batch, n_classes)
    assert jnp.allclose(y, ref, atol=1e-4, rtol=1e-4)

    # Batch-tiled path (exercises grid + resident weight)
    batch2 = 512
    x2 = jax.random.normal(k_x2, (batch2, 3, 32, 32), jnp.float32)
    y2 = jax.block_until_ready(model(x2))
    ref2 = x2.reshape(batch2, -1) @ model.weight.T + model.bias
    assert y2.shape == (batch2, n_classes)
    assert jnp.allclose(y2, ref2, atol=1e-3, rtol=1e-4)

    # Batch-tiled path with a partial last tile (masked writeback)
    batch3 = 300
    x3 = jax.random.normal(k_x3, (batch3, 3, 32, 32), jnp.float32)
    y3 = jax.block_until_ready(model(x3))
    ref3 = x3.reshape(batch3, -1) @ model.weight.T + model.bias
    assert y3.shape == (batch3, n_classes)
    assert jnp.allclose(y3, ref3, atol=1e-3, rtol=1e-4)

    print("KERNEL_OK")
</pallas_src>

<mosaic_0001>
module attributes {stable_mosaic.version = 11 : i64} {
  func.func @_linear_kernel(%arg0: memref<2x3072xf32, #tpu.memory_space<vmem>>, %arg1: memref<3072x128xf32, #tpu.memory_space<vmem>>, %arg2: memref<1x128xf32, #tpu.memory_space<vmem>>, %arg3: memref<2x128xf32, #tpu.memory_space<vmem>>) attributes {dimension_semantics = [], scalar_prefetch = 0 : i64, scratch_operands = 0 : i64, tpu.core_type = #tpu.core_type<tc>} {
    %c0 = arith.constant 0 : index
    %c0_0 = arith.constant 0 : index
    %0 = vector.load %arg0[%c0, %c0_0] : memref<2x3072xf32, #tpu.memory_space<vmem>>, vector<2x3072xf32>
    %c0_1 = arith.constant 0 : index
    %c0_2 = arith.constant 0 : index
    %1 = vector.load %arg1[%c0_1, %c0_2] : memref<3072x128xf32, #tpu.memory_space<vmem>>, vector<3072x128xf32>
    %cst = arith.constant dense<0.000000e+00> : vector<2x128xf32>
    %2 = tpu.matmul %0, %1, %cst {dimension_numbers = #tpu.dot_dimension_numbers<[1], [0], [0], [1], [0, 0, 1, 1], [], []>} : vector<2x3072xf32>, vector<3072x128xf32>, vector<2x128xf32> -> vector<2x128xf32>
    %c0_3 = arith.constant 0 : index
    %c0_4 = arith.constant 0 : index
    %3 = vector.load %arg2[%c0_3, %c0_4] : memref<1x128xf32, #tpu.memory_space<vmem>>, vector<1x128xf32>
    %4 = vector.broadcast %3 : vector<1x128xf32> to vector<2x128xf32>
    %5 = arith.addf %2, %4 : vector<2x128xf32>
    %c0_5 = arith.constant 0 : index
    %c0_6 = arith.constant 0 : index
    %6 = vector.load %arg3[%c0_5, %c0_6] : memref<2x128xf32, #tpu.memory_space<vmem>>, vector<2x128xf32>
    tpu.vector_store %arg3[%c0_5, %c0_6], %5 {strides = array<i32>} : memref<2x128xf32, #tpu.memory_space<vmem>>, vector<2x128xf32>,
    return
  }
}

</mosaic_0001>

<bundles_post_ra>
// kernel: _fwd.1
= control target key start
LH: loop header
LB: loop body
LE: loop exit
PB: predicated region body
PF: predicated region fallthrough
CT: control target
= control target key end

     0   :  { %8 = vsyncpa [#allocation3], 0  ;;  %s2460_s0 = inlined_call_operand.vmem [shape: f32[2,3072], index: 0, kind: input, shape index: {}]   ;;  %s2461_s1 = inlined_call_operand.hbm [shape: f32[3072,128], index: 1, kind: input, shape index: {}]   ;;  %s2462_s2 = inlined_call_operand.hbm [shape: f32[1,128], index: 2, kind: input, shape index: {}]   ;;  %s2463_s3 = inlined_call_operand.hbm [shape: f32[2,128], index: 3, kind: output, shape index: {}]  }
   0x1   :  { %9 = vsyncpa [#allocation6], 0 }
   0x2   :  { %10 = vsyncpa [#allocation4], 0  ;;  %s2316_s12 = smov [#allocation2]   ;;  %s2244_s16 = scalar_lea.hbm %s2461_s1, 49152 }
   0x3   :  { %s18_s13 = sshll.u32 %s2316_s12, 4  ;;  %p2245_p0 = scmp.ne.s32.totalorder %s2461_s1, %s2244_s16  ;;  %s19_s13 = int_to_ptr.vmem [resolvable:$true] %s18_s13 }
   0x4   :  { %p2248_p1 = scmp.lt.u32.totalorder %s2244_s16, %s2461_s1 }
   0x6   :  { %p2250_p2 = pnand %p2248_p1, %p2245_p0 }
   0x8   :  { %2253 = shalt.err (!%p2250_p2)
}
   0x9   :  { %s2254_s21 = scalar_lea.vmem %s19_s13, 49152  ;;  %p2259_p4 = scmp.lt.s32.totalorder %s19_s13, %s19_s13 }
   0xa   :  { %p2255_p3 = scmp.ne.s32.totalorder %s19_s13, %s2254_s21  ;;  %p2260_p5 = scmp.lt.s32.totalorder %s2254_s21, %s2254_s21 }
   0xc   :  { %p2261_p6 = por %p2260_p5, %p2259_p4 }
   0xe   :  { %p2262_p7 = pnand %p2261_p6, %p2255_p3 }
  0x10   :  { %2265 = shalt.err (!%p2262_p7)
}
  0x11   :  { %s2317_s22 = smov 128   ;;  %s2318_s23 = smov 8  }
  0x12   :  { %24 = dma.hbm_to_vmem [thread:$0]  %s2461_s1, 49152, %s19_s13, [#allocation3], %s2317_s22, %s2317_s22, %s2318_s23  }
  0x13   :  { %s2319_s26 = smov [#allocation5]   ;;  %s2266_s30 = scalar_lea.hbm %s2462_s2, 16 }
  0x14   :  { %s31_s27 = sshll.u32 %s2319_s26, 4  ;;  %p2267_p8 = scmp.ne.s32.totalorder %s2462_s2, %s2266_s30  ;;  %s32_s27 = int_to_ptr.vmem [resolvable:$true] %s31_s27 }
  0x15   :  { %p2270_p9 = scmp.lt.u32.totalorder %s2266_s30, %s2462_s2 }
  0x17   :  { %p2272_p10 = pnand %p2270_p9, %p2267_p8 }
  0x19   :  { %2275 = shalt.err (!%p2272_p10)
}
  0x1a   :  { %s2276_s8 = scalar_lea.vmem %s32_s27, 16  ;;  %s2280_s1 = scalar_lea.vmem %s32_s27, 32 }
  0x1b   :  { %p2277_p11 = scmp.ne.s32.totalorder %s32_s27, %s2276_s8  ;;  %p2281_p12 = scmp.lt.s32.totalorder %s32_s27, %s32_s27 }
  0x1c   :  { %p2282_p13 = scmp.lt.s32.totalorder %s2280_s1, %s2276_s8 }
  0x1e   :  { %p2283_p0 = por %p2282_p13, %p2281_p12 }
  0x20   :  { %p2284_p1 = pnand %p2283_p0, %p2277_p11 }
  0x22   :  { %2287 = shalt.err (!%p2284_p1)
}
  0x23   :  { %34 = dma.hbm_to_vmem [thread:$0]  %s2462_s2, 16, %s32_s27, [#allocation6]  }
  0x24   :  { %2310 = dma.done.wait [#allocation3], 49152  }
  0x25   :  { %2311 = vsyncadd [#allocation3], 4294918144 }
  0x26   :  { %2312 = dma.done.wait [#allocation6], 16  }
  0x27   :  { %2313 = vsyncadd [#allocation6], 4294967280  ;;  %v63_v0 = vld [vmem:[#allocation2 + $0x80] sm:$0xff]  ;;  %v64_v1 = vld [vmem:[#allocation2 + $0x88] sm:$0xff]  ;;  %v2320_v47 = vmov 1983009808   ;;  %v448_v49 = vlaneseq }
  0x28   :  { %v47_v2 = vld [vmem:[#allocation2] sm:$0xff]  ;;  %v1848_v3 = vpack.c.bf16 %v64_v1, %v63_v0  ;;  %v48_v4 = vld [vmem:[#allocation2 + $0x8] sm:$0xff]  ;;  %v65_v11 = vld [vmem:[#allocation2 + $0x90] sm:$0xff]  ;;  %v446_v48 = vunpack.c.l.s4 %v2320_v47 }
  0x29   :  { %v95_v5 = vld [vmem:[#allocation2 + $0x180] sm:$0xff]  ;;  %v96_v6 = vld [vmem:[#allocation2 + $0x188] sm:$0xff]  ;;  %v1850_v7 = vpack.c.bf16 %v48_v4, %v47_v2  ;;  %v66_v13 = vld [vmem:[#allocation2 + $0x98] sm:$0xff]  ;;  %v449_v0 = vshrl.u32 %v448_v49, 7 }
  0x2a   :  { %v1880_v8 = vpack.c.bf16 %v96_v6, %v95_v5  ;;  %v79_v9 = vld [vmem:[#allocation2 + $0x100] sm:$0xff]  ;;  %v80_v10 = vld [vmem:[#allocation2 + $0x108] sm:$0xff]  ;;  %1849 = vmatprep.subr.bf16.mxu0 %v1848_v3  ;;  %v49_v14 = vld [vmem:[#allocation2 + $0x10] sm:$0xff]  ;;  %v1852_v16 = vpack.c.bf16 %v66_v13, %v65_v11  ;;  %v447_v63 = vunpack.c.0.s8 %v446_v48 }
  0x2b   :  { %v1882_v12 = vpack.c.bf16 %v80_v10, %v79_v9  ;;  %v50_v15 = vld [vmem:[#allocation2 + $0x18] sm:$0xff]  ;;  %1851 = vmatpush3.bf16.msra.mxu0 %v1850_v7  ;;  %v97_v18 = vld [vmem:[#allocation2 + $0x190] sm:$0xff]  ;;  %v67_v23 = vld [vmem:[#allocation2 + $0xa0] sm:$0xff] }
  0x2c   :  { %1881 = vmatprep.subr.bf16.mxu1 %v1880_v8  ;;  %v1854_v17 = vpack.c.bf16 %v50_v15, %v49_v14  ;;  %v98_v19 = vld [vmem:[#allocation2 + $0x198] sm:$0xff]  ;;  %v81_v20 = vld [vmem:[#allocation2 + $0x110] sm:$0xff]  ;;  %v68_v24 = vld [vmem:[#allocation2 + $0xa8] sm:$0xff]  ;;  %1853 = vmatprep.subr.bf16.mxu0 %v1852_v16  ;;  %v2366_v13 = vsub.s32 %v447_v63, %v449_v0 }
  0x2d   :  { %1883 = vmatpush3.bf16.msra.mxu1 %v1882_v12  ;;  %v1884_v21 = vpack.c.bf16 %v98_v19, %v97_v18  ;;  %v82_v22 = vld [vmem:[#allocation2 + $0x118] sm:$0xff]  ;;  %v1856_v26 = vpack.c.bf16 %v68_v24, %v67_v23  ;;  %v51_v27 = vld [vmem:[#allocation2 + $0x20] sm:$0xff]  ;;  %v52_v28 = vld [vmem:[#allocation2 + $0x28] sm:$0xff] }
  0x2e   :  { %v1886_v25 = vpack.c.bf16 %v82_v22, %v81_v20  ;;  %v99_v29 = vld [vmem:[#allocation2 + $0x1a0] sm:$0xff]  ;;  %v100_v30 = vld [vmem:[#allocation2 + $0x1a8] sm:$0xff]  ;;  %v1858_v33 = vpack.c.bf16 %v52_v28, %v51_v27  ;;  %v69_v35 = vld [vmem:[#allocation2 + $0xb0] sm:$0xff] }
  0x2f   :  { %1885 = vmatprep.subr.bf16.mxu1 %v1884_v21  ;;  %v83_v31 = vld [vmem:[#allocation2 + $0x120] sm:$0xff]  ;;  %v84_v32 = vld [vmem:[#allocation2 + $0x128] sm:$0xff]  ;;  %1855 = vmatpush3.bf16.msra.mxu0 %v1854_v17  ;;  %v1888_v34 = vpack.c.bf16 %v100_v30, %v99_v29  ;;  %v70_v36 = vld [vmem:[#allocation2 + $0xb8] sm:$0xff] }
  0x30   :  { %v53_v37 = vld [vmem:[#allocation2 + $0x30] sm:$0xff]  ;;  %1857 = vmatprep.subr.bf16.mxu0 %v1856_v26  ;;  %v1890_v38 = vpack.c.bf16 %v84_v32, %v83_v31  ;;  %v1860_v39 = vpack.c.bf16 %v70_v36, %v69_v35  ;;  %v54_v40 = vld [vmem:[#allocation2 + $0x38] sm:$0xff]  ;;  %v71_v46 = vld [vmem:[#allocation2 + $0xc0] sm:$0xff] }
  0x31   :  { %1887 = vmatpush3.bf16.msra.mxu1 %v1886_v25  ;;  %v101_v41 = vld [vmem:[#allocation2 + $0x1b0] sm:$0xff]  ;;  %v102_v42 = vld [vmem:[#allocation2 + $0x1b8] sm:$0xff]  ;;  %v72_v50 = vld [vmem:[#allocation2 + $0xc8] sm:$0xff]  ;;  %v1862_v51 = vpack.c.bf16 %v54_v40, %v53_v37 }
  0x32   :  { %1889 = vmatprep.subr.bf16.mxu1 %v1888_v34  ;;  %v1892_v43 = vpack.c.bf16 %v102_v42, %v101_v41  ;;  %v85_v44 = vld [vmem:[#allocation2 + $0x130] sm:$0xff]  ;;  %v86_v45 = vld [vmem:[#allocation2 + $0x138] sm:$0xff]  ;;  %v103_v52 = vld [vmem:[#allocation2 + $0x1c0] sm:$0xff]  ;;  %v1864_v55 = vpack.c.bf16 %v72_v50, %v71_v46 }
  0x33   :  { %1859 = vmatpush3.bf16.msra.mxu0 %v1858_v33  ;;  %v104_v53 = vld [vmem:[#allocation2 + $0x1c8] sm:$0xff]  ;;  %v1894_v54 = vpack.c.bf16 %v86_v45, %v85_v44  ;;  %v55_v56 = vld [vmem:[#allocation2 + $0x40] sm:$0xff]  ;;  %v73_v61 = vld [vmem:[#allocation2 + $0xd0] sm:$0xff] }
  0x34   :  { %1861 = vmatprep.subr.bf16.mxu0 %v1860_v39  ;;  %v56_v57 = vld [vmem:[#allocation2 + $0x48] sm:$0xff]  ;;  %v87_v58 = vld [vmem:[#allocation2 + $0x140] sm:$0xff]  ;;  %v1896_v59 = vpack.c.bf16 %v104_v53, %v103_v52  ;;  %v74_v62 = vld [vmem:[#allocation2 + $0xd8] sm:$0xff] }
  0x35   :  { %1891 = vmatpush3.bf16.msra.mxu1 %v1890_v38  ;;  %v88_v60 = vld [vmem:[#allocation2 + $0x148] sm:$0xff]  ;;  %v105_v1 = vld [vmem:[#allocation2 + $0x1d0] sm:$0xff]  ;;  %v106_v2 = vld [vmem:[#allocation2 + $0x1d8] sm:$0xff]  ;;  %v1866_v3 = vpack.c.bf16 %v56_v57, %v55_v56  ;;  %v1868_v5 = vpack.c.bf16 %v74_v62, %v73_v61 }
  0x36   :  { %1893 = vmatprep.subr.bf16.mxu1 %v1892_v43  ;;  %v1898_v4 = vpack.c.bf16 %v88_v60, %v87_v58  ;;  %v57_v6 = vld [vmem:[#allocation2 + $0x50] sm:$0xff]  ;;  %v58_v7 = vld [vmem:[#allocation2 + $0x58] sm:$0xff]  ;;  %v1900_v9 = vpack.c.bf16 %v106_v2, %v105_v1  ;;  %v75_v11 = vld [vmem:[#allocation2 + $0xe0] sm:$0xff] }
  0x37   :  { %1863 = vmatpush3.bf16.msra.mxu0 %v1862_v51  ;;  %v89_v8 = vld [vmem:[#allocation2 + $0x150] sm:$0xff]  ;;  %v90_v10 = vld [vmem:[#allocation2 + $0x158] sm:$0xff]  ;;  %v76_v12 = vld [vmem:[#allocation2 + $0xe8] sm:$0xff]  ;;  %v1870_v16 = vpack.c.bf16 %v58_v7, %v57_v6 }
  0x38   :  { %1865 = vmatprep.subr.bf16.mxu0 %v1864_v55  ;;  %v107_v14 = vld [vmem:[#allocation2 + $0x1e0] sm:$0xff]  ;;  %v108_v15 = vld [vmem:[#allocation2 + $0x1e8] sm:$0xff]  ;;  %v1902_v18 = vpack.c.bf16 %v90_v10, %v89_v8  ;;  %v1872_v19 = vpack.c.bf16 %v76_v12, %v75_v11  ;;  %v77_v25 = vld [vmem:[#allocation2 + $0xf0] sm:$0xff] }
  0x39   :  { %1895 = vmatpush3.bf16.msra.mxu1 %v1894_v54  ;;  %v59_v17 = vld [vmem:[#allocation2 + $0x60] sm:$0xff]  ;;  %v60_v20 = vld [vmem:[#allocation2 + $0x68] sm:$0xff]  ;;  %v1904_v23 = vpack.c.bf16 %v108_v15, %v107_v14  ;;  %v78_v26 = vld [vmem:[#allocation2 + $0xf8] sm:$0xff] }
  0x3a   :  { %1897 = vmatprep.subr.bf16.mxu1 %v1896_v59  ;;  %v91_v21 = vld [vmem:[#allocation2 + $0x160] sm:$0xff]  ;;  %v92_v24 = vld [vmem:[#allocation2 + $0x168] sm:$0xff]  ;;  %v109_v29 = vld [vmem:[#allocation2 + $0x1f0] sm:$0xff]  ;;  %v1874_v31 = vpack.c.bf16 %v60_v20, %v59_v17  ;;  %v1876_v35 = vpack.c.bf16 %v78_v26, %v77_v25 }
  0x3b   :  { %1867 = vmatpush3.bf16.msra.mxu0 %v1866_v3  ;;  %v41_v22 = vld [vmem:[%s2460_s0] sm:$0xff]  ;;  %v110_v30 = vld [vmem:[#allocation2 + $0x1f8] sm:$0xff]  ;;  %v1906_v34 = vpack.c.bf16 %v92_v24, %v91_v21  ;;  %v61_v36 = vld [vmem:[#allocation2 + $0x70] sm:$0xff] }
  0x3c   :  { %1869 = vmatprep.subr.bf16.mxu0 %v1868_v5  ;;  %v451_v27 = vrot.slane %v41_v22, %v2366_v13  ;;  %v444_v28 = vcombine.high %v41_v22, %v41_v22  ;;  %v62_v37 = vld [vmem:[#allocation2 + $0x78] sm:$0xff]  ;;  %v93_v38 = vld [vmem:[#allocation2 + $0x170] sm:$0xff]  ;;  %v1908_v39 = vpack.c.bf16 %v110_v30, %v109_v29  ;;  %v127_v41 = vld [vmem:[#allocation2 + $0x280] sm:$0xff] }
  0x3d   :  { %1899 = vmatpush3.bf16.msra.mxu1 %v1898_v4  ;;  %v94_v40 = vld [vmem:[#allocation2 + $0x178] sm:$0xff]  ;;  %v128_v42 = vld [vmem:[#allocation2 + $0x288] sm:$0xff]  ;;  %v159_v44 = vld [vmem:[#allocation2 + $0x380] sm:$0xff]  ;;  %v1878_v46 = vpack.c.bf16 %v62_v37, %v61_v36 }
  0x3e   :  { %1901 = vmatprep.subr.bf16.mxu1 %v1900_v9  ;;  %v459_v32 = vcombine.high %v451_v27, %v451_v27  ;;  %v458_v33 = vrot.slane %v444_v28, %v2366_v13  ;;  %v160_v45 = vld [vmem:[#allocation2 + $0x388] sm:$0xff]  ;;  %v1910_v47 = vpack.c.bf16 %v94_v40, %v93_v38  ;;  %v1912_v48 = vpack.c.bf16 %v128_v42, %v127_v41  ;;  %v111_v49 = vld [vmem:[#allocation2 + $0x200] sm:$0xff]  ;;  %v129_v54 = vld [vmem:[#allocation2 + $0x290] sm:$0xff] }
  0x3f   :  { %1871 = vmatpush3.bf16.msra.mxu0 %v1870_v16  ;;  %v112_v50 = vld [vmem:[#allocation2 + $0x208] sm:$0xff]  ;;  %v143_v51 = vld [vmem:[#allocation2 + $0x300] sm:$0xff]  ;;  %v1944_v52 = vpack.c.bf16 %v160_v45, %v159_v44  ;;  %v130_v55 = vld [vmem:[#allocation2 + $0x298] sm:$0xff] }
  0x40   :  { %1873 = vmatprep.subr.bf16.mxu0 %v1872_v19  ;;  %634 = vmatprep.mubr.f32.mxu0 %v459_v32  ;;  %v460_v43 = vcombine.high %v458_v33, %v458_v33  ;;  %v144_v53 = vld [vmem:[#allocation2 + $0x308] sm:$0xff]  ;;  %v161_v56 = vld [vmem:[#allocation2 + $0x390] sm:$0xff]  ;;  %v162_v57 = vld [vmem:[#allocation2 + $0x398] sm:$0xff]  ;;  %v1914_v58 = vpack.c.bf16 %v112_v50, %v111_v49  ;;  %v1916_v60 = vpack.c.bf16 %v130_v55, %v129_v54 }
  0x41   :  { %1903 = vmatpush3.bf16.msra.mxu1 %v1902_v18  ;;  %v1946_v59 = vpack.c.bf16 %v144_v53, %v143_v51  ;;  %v113_v61 = vld [vmem:[#allocation2 + $0x210] sm:$0xff]  ;;  %v114_v62 = vld [vmem:[#allocation2 + $0x218] sm:$0xff]  ;;  %v1948_v0 = vpack.c.bf16 %v162_v57, %v161_v56  ;;  %v131_v2 = vld [vmem:[#allocation2 + $0x2a0] sm:$0xff] }
  0x42   :  { %1905 = vmatprep.subr.bf16.mxu1 %v1904_v23  ;;  %704 = vmatprep.mubr.f32.mxu1 %v460_v43  ;;  %v145_v63 = vld [vmem:[#allocation2 + $0x310] sm:$0xff]  ;;  %v146_v1 = vld [vmem:[#allocation2 + $0x318] sm:$0xff]  ;;  %v132_v3 = vld [vmem:[#allocation2 + $0x2a8] sm:$0xff]  ;;  %v1918_v6 = vpack.c.bf16 %v114_v62, %v113_v61 }
  0x43   :  { %1875 = vmatpush3.bf16.msra.mxu0 %v1874_v31  ;;  %v163_v4 = vld [vmem:[#allocation2 + $0x3a0] sm:$0xff]  ;;  %v164_v5 = vld [vmem:[#allocation2 + $0x3a8] sm:$0xff]  ;;  %v1950_v7 = vpack.c.bf16 %v146_v1, %v145_v63  ;;  %v1920_v8 = vpack.c.bf16 %v132_v3, %v131_v2  ;;  %v133_v15 = vld [vmem:[#allocation2 + $0x2b0] sm:$0xff] }
  0x44   :  { %1877 = vmatprep.subr.bf16.mxu0 %v1876_v35  ;;  %v115_v9 = vld [vmem:[#allocation2 + $0x220] sm:$0xff]  ;;  %v116_v10 = vld [vmem:[#allocation2 + $0x228] sm:$0xff]  ;;  %v1952_v12 = vpack.c.bf16 %v164_v5, %v163_v4  ;;  %v134_v16 = vld [vmem:[#allocation2 + $0x2b8] sm:$0xff] }
  0x45   :  { %1907 = vmatpush3.bf16.msra.mxu1 %v1906_v34  ;;  %v147_v11 = vld [vmem:[#allocation2 + $0x320] sm:$0xff]  ;;  %v148_v14 = vld [vmem:[#allocation2 + $0x328] sm:$0xff]  ;;  %v165_v17 = vld [vmem:[#allocation2 + $0x3b0] sm:$0xff]  ;;  %v1922_v19 = vpack.c.bf16 %v116_v10, %v115_v9  ;;  %v1924_v21 = vpack.c.bf16 %v134_v16, %v133_v15 }
  0x46   :  { %1909 = vmatprep.subr.bf16.mxu1 %v1908_v39  ;;  %v166_v18 = vld [vmem:[#allocation2 + $0x3b8] sm:$0xff]  ;;  %v1954_v20 = vpack.c.bf16 %v148_v14, %v147_v11  ;;  %v117_v22 = vld [vmem:[#allocation2 + $0x230] sm:$0xff]  ;;  %v136_v28 = vld [vmem:[#allocation2 + $0x2c8] sm:$0xff] }
  0x47   :  { %1879 = vmatpush3.bf16.msra.mxu0 %v1878_v46  ;;  %v118_v23 = vld [vmem:[#allocation2 + $0x238] sm:$0xff]  ;;  %v149_v24 = vld [vmem:[#allocation2 + $0x330] sm:$0xff]  ;;  %v1956_v25 = vpack.c.bf16 %v166_v18, %v165_v17  ;;  %v167_v29 = vld [vmem:[#allocation2 + $0x3c0] sm:$0xff] }
  0x48   :  { %1913 = vmatprep.subr.bf16.mxu0 %v1912_v48  ;;  %v150_v26 = vld [vmem:[#allocation2 + $0x338] sm:$0xff]  ;;  %v168_v30 = vld [vmem:[#allocation2 + $0x3c8] sm:$0xff]  ;;  %v1926_v32 = vpack.c.bf16 %v118_v23, %v117_v22  ;;  %v119_v37 = vld [vmem:[#allocation2 + $0x240] sm:$0xff] }
  0x49   :  { %1911 = vmatpush3.bf16.msra.mxu1 %v1910_v47  ;;  %v42_v31 = vld [vmem:[%s2460_s0 + $0x8] sm:$0xff]  ;;  %v1958_v35 = vpack.c.bf16 %v150_v26, %v149_v24  ;;  %v151_v39 = vld [vmem:[#allocation2 + $0x340] sm:$0xff]  ;;  %v1960_v40 = vpack.c.bf16 %v168_v30, %v167_v29  ;;  %v137_v42 = vld [vmem:[#allocation2 + $0x2d0] sm:$0xff] }
  0x4a   :  { %1945 = vmatprep.subr.bf16.mxu1 %v1944_v52  ;;  %635 = vmatmul.mubr.f32.vlgmr.msra.gmra.mrb[0].mxu0 %v451_v27  ;;  %v135_v27 = vld [vmem:[#allocation2 + $0x2c0] sm:$0xff]  ;;  %v461_v34 = vcombine.high %v42_v31, %v42_v31  ;;  %v120_v38 = vld [vmem:[#allocation2 + $0x248] sm:$0xff]  ;;  %v138_v43 = vld [vmem:[#allocation2 + $0x2d8] sm:$0xff] }
  0x4b   :  { %1915 = vmatpush3.bf16.msra.mxu0 %v1914_v58  ;;  %v1928_v36 = vpack.c.bf16 %v136_v28, %v135_v27  ;;  %v152_v41 = vld [vmem:[#allocation2 + $0x348] sm:$0xff]  ;;  %v169_v46 = vld [vmem:[#allocation2 + $0x3d0] sm:$0xff]  ;;  %v170_v47 = vld [vmem:[#allocation2 + $0x3d8] sm:$0xff]  ;;  %v1930_v48 = vpack.c.bf16 %v120_v38, %v119_v37  ;;  %v1932_v51 = vpack.c.bf16 %v138_v43, %v137_v42 }
  0x4c   :  { %705 = vmatmul.mubr.f32.vlgmr.msra.gmra.mrb[0].mxu1 %v458_v33  ;;  %1917 = vmatprep.subr.bf16.mxu0 %v1916_v60  ;;  %v2377_v33 = vrot.slane %v42_v31, %v2366_v13  ;;  %v2382_v45 = vrot.slane %v461_v34, %v2366_v13  ;;  %v1962_v50 = vpack.c.bf16 %v152_v41, %v151_v39  ;;  %v121_v52 = vld [vmem:[#allocation2 + $0x250] sm:$0xff]  ;;  %v122_v53 = vld [vmem:[#allocation2 + $0x258] sm:$0xff]  ;;  %v139_v57 = vld [vmem:[#allocation2 + $0x2e0] sm:$0xff] }
  0x4d   :  { %1947 = vmatpush3.bf16.msra.mxu1 %v1946_v59  ;;  %v153_v54 = vld [vmem:[#allocation2 + $0x350] sm:$0xff]  ;;  %v1964_v55 = vpack.c.bf16 %v170_v47, %v169_v46  ;;  %v154_v56 = vld [vmem:[#allocation2 + $0x358] sm:$0xff]  ;;  %v140_v58 = vld [vmem:[#allocation2 + $0x2e8] sm:$0xff]  ;;  %v1934_v61 = vpack.c.bf16 %v122_v53, %v121_v52 }
  0x4e   :  { %1949 = vmatprep.subr.bf16.mxu1 %v1948_v0  ;;  %v476_v44 = vcombine.high %v2377_v33, %v2377_v33  ;;  %v477_v49 = vcombine.high %v2382_v45, %v2382_v45  ;;  %v171_v59 = vld [vmem:[#allocation2 + $0x3e0] sm:$0xff]  ;;  %v172_v60 = vld [vmem:[#allocation2 + $0x3e8] sm:$0xff]  ;;  %v1966_v62 = vpack.c.bf16 %v154_v56, %v153_v54  ;;  %v1936_v63 = vpack.c.bf16 %v140_v58, %v139_v57  ;;  %v141_v5 = vld [vmem:[#allocation2 + $0x2f0] sm:$0xff] }
  0x4f   :  { %1919 = vmatpush3.bf16.msra.mxu0 %v1918_v6  ;;  %v123_v0 = vld [vmem:[#allocation2 + $0x260] sm:$0xff]  ;;  %v124_v1 = vld [vmem:[#allocation2 + $0x268] sm:$0xff]  ;;  %v1968_v3 = vpack.c.bf16 %v172_v60, %v171_v59  ;;  %v142_v6 = vld [vmem:[#allocation2 + $0x2f8] sm:$0xff] }
  0x50   :  { %1921 = vmatprep.subr.bf16.mxu0 %v1920_v8  ;;  %774 = vmatprep.mubr.f32.mxu0 %v476_v44  ;;  %v155_v2 = vld [vmem:[#allocation2 + $0x360] sm:$0xff]  ;;  %v156_v4 = vld [vmem:[#allocation2 + $0x368] sm:$0xff]  ;;  %v174_v8 = vld [vmem:[#allocation2 + $0x3f8] sm:$0xff]  ;;  %v1938_v9 = vpack.c.bf16 %v124_v1, %v123_v0  ;;  %v1940_v11 = vpack.c.bf16 %v142_v6, %v141_v5 }
  0x51   :  { %1951 = vmatpush3.bf16.msra.mxu1 %v1950_v7  ;;  %844 = vmatprep.mubr.f32.mxu1 %v477_v49  ;;  %v173_v7 = vld [vmem:[#allocation2 + $0x3f0] sm:$0xff]  ;;  %v1970_v10 = vpack.c.bf16 %v156_v4, %v155_v2  ;;  %v126_v14 = vld [vmem:[#allocation2 + $0x278] sm:$0xff]  ;;  %v191_v18 = vld [vmem:[#allocation2 + $0x480] sm:$0xff] }
  0x52   :  { %1953 = vmatprep.subr.bf16.mxu1 %v1952_v12  ;;  %v125_v12 = vld [vmem:[#allocation2 + $0x270] sm:$0xff]  ;;  %v1972_v16 = vpack.c.bf16 %v174_v8, %v173_v7  ;;  %v158_v17 = vld [vmem:[#allocation2 + $0x378] sm:$0xff]  ;;  %v175_v23 = vld [vmem:[#allocation2 + $0x400] sm:$0xff] }
  0x53   :  { %1923 = vmatpush3.bf16.msra.mxu0 %v1922_v19  ;;  %v157_v15 = vld [vmem:[#allocation2 + $0x370] sm:$0xff]  ;;  %v192_v19 = vld [vmem:[#allocation2 + $0x488] sm:$0xff]  ;;  %v1942_v22 = vpack.c.bf16 %v126_v14, %v125_v12  ;;  %v207_v27 = vld [vmem:[#allocation2 + $0x500] sm:$0xff] }
  0x54   :  { %1925 = vmatprep.subr.bf16.mxu0 %v1924_v21  ;;  %v224_v21 = vld [vmem:[#allocation2 + $0x588] sm:$0xff]  ;;  %v1974_v24 = vpack.c.bf16 %v158_v17, %v157_v15  ;;  %v193_v30 = vld [vmem:[#allocation2 + $0x490] sm:$0xff]  ;;  %v194_v31 = vld [vmem:[#allocation2 + $0x498] sm:$0xff] }
  0x55   :  { %1955 = vmatpush3.bf16.msra.mxu1 %v1954_v20  ;;  %v223_v20 = vld [vmem:[#allocation2 + $0x580] sm:$0xff]  ;;  %v176_v26 = vld [vmem:[#allocation2 + $0x408] sm:$0xff]  ;;  %v226_v34 = vld [vmem:[#allocation2 + $0x598] sm:$0xff]  ;;  %v1980_v38 = vpack.c.bf16 %v194_v31, %v193_v30 }
  0x56   :  { %1957 = vmatprep.subr.bf16.mxu1 %v1956_v25  ;;  %v1976_v25 = vpack.c.bf16 %v192_v19, %v191_v18  ;;  %v208_v28 = vld [vmem:[#allocation2 + $0x508] sm:$0xff]  ;;  %v2008_v29 = vpack.c.bf16 %v224_v21, %v223_v20  ;;  %v43_v37 = vld [vmem:[%s2460_s0 + $0x10] sm:$0xff]  ;;  %v210_v46 = vld [vmem:[#allocation2 + $0x518] sm:$0xff] }
  0x57   :  { %1927 = vmatpush3.bf16.msra.mxu0 %v1926_v32  ;;  %v225_v32 = vld [vmem:[#allocation2 + $0x590] sm:$0xff]  ;;  %v2390_v42 = vrot.slane %v43_v37, %v2366_v13  ;;  %v478_v43 = vcombine.high %v43_v37, %v43_v37  ;;  %v195_v47 = vld [vmem:[#allocation2 + $0x4a0] sm:$0xff]  ;;  %v180_v57 = vld [vmem:[#allocation2 + $0x428] sm:$0xff] }
  0x58   :  { %1929 = vmatprep.subr.bf16.mxu0 %v1928_v36  ;;  %v2010_v36 = vpack.c.bf16 %v208_v28, %v207_v27  ;;  %v177_v39 = vld [vmem:[#allocation2 + $0x410] sm:$0xff]  ;;  %v2012_v44 = vpack.c.bf16 %v226_v34, %v225_v32  ;;  %v227_v49 = vld [vmem:[#allocation2 + $0x5a0] sm:$0xff]  ;;  %v212_v60 = vld [vmem:[#allocation2 + $0x528] sm:$0xff] }
  0x59   :  { %1959 = vmatpush3.bf16.msra.mxu1 %v1958_v35  ;;  %v1978_v35 = vpack.c.bf16 %v176_v26, %v175_v23  ;;  %v209_v41 = vld [vmem:[#allocation2 + $0x510] sm:$0xff]  ;;  %v2396_v52 = vrot.slane %v478_v43, %v2366_v13  ;;  %v179_v56 = vld [vmem:[#allocation2 + $0x420] sm:$0xff]  ;;  %v230_v0 = vld [vmem:[#allocation2 + $0x5b8] sm:$0xff] }
  0x5a   :  { %1961 = vmatprep.subr.bf16.mxu1 %v1960_v40  ;;  %v178_v40 = vld [vmem:[#allocation2 + $0x418] sm:$0xff]  ;;  %v2014_v54 = vpack.c.bf16 %v210_v46, %v209_v41  ;;  %v211_v58 = vld [vmem:[#allocation2 + $0x520] sm:$0xff]  ;;  %v213_v5 = vld [vmem:[#allocation2 + $0x530] sm:$0xff] }
  0x5b   :  { %1931 = vmatpush3.bf16.msra.mxu0 %v1930_v48  ;;  %v196_v48 = vld [vmem:[#allocation2 + $0x4a8] sm:$0xff]  ;;  %v1982_v53 = vpack.c.bf16 %v178_v40, %v177_v39  ;;  %v2018_v1 = vpack.c.bf16 %v212_v60, %v211_v58  ;;  %v182_v4 = vld [vmem:[#allocation2 + $0x438] sm:$0xff]  ;;  %v199_v8 = vld [vmem:[#allocation2 + $0x4c0] sm:$0xff] }
  0x5c   :  { %1933 = vmatprep.subr.bf16.mxu0 %v1932_v51  ;;  %v493_v51 = vcombine.high %v2390_v42, %v2390_v42  ;;  %v214_v7 = vld [vmem:[#allocation2 + $0x538] sm:$0xff]  ;;  %v184_v17 = vld [vmem:[#allocation2 + $0x448] sm:$0xff]  ;;  %v215_v18 = vld [vmem:[#allocation2 + $0x540] sm:$0xff] }
  0x5d   :  { %1963 = vmatpush3.bf16.msra.mxu1 %v1962_v50  ;;  %v228_v50 = vld [vmem:[#allocation2 + $0x5a8] sm:$0xff]  ;;  %v2022_v14 = vpack.c.bf16 %v214_v7, %v213_v5  ;;  %v201_v21 = vld [vmem:[#allocation2 + $0x4d0] sm:$0xff]  ;;  %v218_v32 = vld [vmem:[#allocation2 + $0x558] sm:$0xff] }
  0x5e   :  { %1965 = vmatprep.subr.bf16.mxu1 %v1964_v55  ;;  %v1984_v55 = vpack.c.bf16 %v196_v48, %v195_v47  ;;  %v2016_v59 = vpack.c.bf16 %v228_v50, %v227_v49  ;;  %v216_v20 = vld [vmem:[#allocation2 + $0x548] sm:$0xff]  ;;  %v233_v23 = vld [vmem:[#allocation2 + $0x5d0] sm:$0xff]  ;;  %v203_v34 = vld [vmem:[#allocation2 + $0x4e0] sm:$0xff] }
  0x5f   :  { %1935 = vmatpush3.bf16.msra.mxu0 %v1934_v61  ;;  %v197_v61 = vld [vmem:[#allocation2 + $0x4b0] sm:$0xff]  ;;  %v2026_v26 = vpack.c.bf16 %v216_v20, %v215_v18  ;;  %v236_v37 = vld [vmem:[#allocation2 + $0x5e8] sm:$0xff]  ;;  %v187_v41 = vld [vmem:[#allocation2 + $0x460] sm:$0xff] }
  0x60   :  { %1937 = vmatprep.subr.bf16.mxu0 %v1936_v63  ;;  %v229_v63 = vld [vmem:[#allocation2 + $0x5b0] sm:$0xff]  ;;  %v188_v43 = vld [vmem:[#allocation2 + $0x468] sm:$0xff]  ;;  %v206_v49 = vld [vmem:[#allocation2 + $0x4f8] sm:$0xff] }
  0x61   :  { %1967 = vmatpush3.bf16.msra.mxu1 %v1966_v62  ;;  %v198_v62 = vld [vmem:[#allocation2 + $0x4b8] sm:$0xff]  ;;  %v2020_v6 = vpack.c.bf16 %v230_v0, %v229_v63  ;;  %v185_v28 = vld [vmem:[#allocation2 + $0x450] sm:$0xff]  ;;  %v220_v47 = vld [vmem:[#allocation2 + $0x568] sm:$0xff] }
  0x62   :  { %1969 = vmatprep.subr.bf16.mxu1 %v1968_v3  ;;  %v1988_v2 = vpack.c.bf16 %v198_v62, %v197_v61  ;;  %v181_v3 = vld [vmem:[#allocation2 + $0x430] sm:$0xff]  ;;  %v190_v58 = vld [vmem:[#allocation2 + $0x478] sm:$0xff]  ;;  %v255_v61 = vld [vmem:[#allocation2 + $0x680] sm:$0xff] }
  0x63   :  { %1939 = vmatpush3.bf16.msra.mxu0 %v1938_v9  ;;  %v200_v9 = vld [vmem:[#allocation2 + $0x4c8] sm:$0xff]  ;;  %v1990_v12 = vpack.c.bf16 %v182_v4, %v181_v3  ;;  %v217_v30 = vld [vmem:[#allocation2 + $0x550] sm:$0xff]  ;;  %v222_v60 = vld [vmem:[#allocation2 + $0x578] sm:$0xff] }
  0x64   :  { %1941 = vmatprep.subr.bf16.mxu0 %v1940_v11  ;;  %v232_v11 = vld [vmem:[#allocation2 + $0x5c8] sm:$0xff]  ;;  %v1992_v15 = vpack.c.bf16 %v200_v9, %v199_v8  ;;  %v2030_v39 = vpack.c.bf16 %v218_v32, %v217_v30  ;;  %v205_v48 = vld [vmem:[#allocation2 + $0x4f0] sm:$0xff]  ;;  %v287_v63 = vld [vmem:[#allocation2 + $0x780] sm:$0xff] }
  0x65   :  { %1971 = vmatpush3.bf16.msra.mxu1 %v1970_v10  ;;  %v231_v10 = vld [vmem:[#allocation2 + $0x5c0] sm:$0xff]  ;;  %v237_v50 = vld [vmem:[#allocation2 + $0x5f0] sm:$0xff]  ;;  %v256_v62 = vld [vmem:[#allocation2 + $0x688] sm:$0xff] }
  0x66   :  { %1973 = vmatprep.subr.bf16.mxu1 %v1972_v16  ;;  %v183_v16 = vld [vmem:[#allocation2 + $0x440] sm:$0xff]  ;;  %v2024_v19 = vpack.c.bf16 %v232_v11, %v231_v10  ;;  %v288_v0 = vld [vmem:[#allocation2 + $0x788] sm:$0xff]  ;;  %v2040_v3 = vpack.c.bf16 %v256_v62, %v255_v61  ;;  %v257_v9 = vld [vmem:[#allocation2 + $0x690] sm:$0xff] }
  0x67   :  { %1943 = vmatpush3.bf16.msra.mxu0 %v1942_v22  ;;  %v202_v22 = vld [vmem:[#allocation2 + $0x4d8] sm:$0xff]  ;;  %v239_v4 = vld [vmem:[#allocation2 + $0x600] sm:$0xff]  ;;  %v240_v5 = vld [vmem:[#allocation2 + $0x608] sm:$0xff]  ;;  %v2072_v7 = vpack.c.bf16 %v288_v0, %v287_v63 }
  0x68   :  { %1977 = vmatprep.subr.bf16.mxu0 %v1976_v25  ;;  %v1994_v25 = vpack.c.bf16 %v184_v17, %v183_v16  ;;  %v1996_v27 = vpack.c.bf16 %v202_v22, %v201_v21  ;;  %v272_v8 = vld [vmem:[#allocation2 + $0x708] sm:$0xff]  ;;  %v258_v10 = vld [vmem:[#allocation2 + $0x698] sm:$0xff]  ;;  %v2042_v16 = vpack.c.bf16 %v240_v5, %v239_v4  ;;  %v273_v21 = vld [vmem:[#allocation2 + $0x710] sm:$0xff] }
  0x69   :  { %1975 = vmatpush3.bf16.msra.mxu1 %v1974_v24  ;;  %v234_v24 = vld [vmem:[#allocation2 + $0x5d8] sm:$0xff]  ;;  %v2044_v18 = vpack.c.bf16 %v258_v10, %v257_v9  ;;  %v280_v62 = vld [vmem:[#allocation2 + $0x748] sm:$0xff]  ;;  %v265_v63 = vld [vmem:[#allocation2 + $0x6d0] sm:$0xff] }
  0x6a   :  { %2009 = vmatprep.subr.bf16.mxu1 %v2008_v29  ;;  %775 = vmatmul.mubr.f32.vlgmr.msra.gmra.mrb[2].mxu0 %v2377_v33  ;;  %v494_v33 = vcombine.high %v2396_v52, %v2396_v52  ;;  %v186_v29 = vld [vmem:[#allocation2 + $0x458] sm:$0xff]  ;;  %v2028_v31 = vpack.c.bf16 %v234_v24, %v233_v23  ;;  %v259_v24 = vld [vmem:[#allocation2 + $0x6a0] sm:$0xff]  ;;  %v249_v5 = vld [vmem:[#allocation2 + $0x650] sm:$0xff] }
  0x6b   :  { %1979 = vmatpush3.bf16.msra.mxu0 %v1978_v35  ;;  %914 = vmatprep.mubr.f32.mxu0 %v493_v51  ;;  %v204_v35 = vld [vmem:[#allocation2 + $0x4e8] sm:$0xff]  ;;  %v238_v51 = vld [vmem:[#allocation2 + $0x5f8] sm:$0xff]  ;;  %v267_v10 = vld [vmem:[#allocation2 + $0x6e0] sm:$0xff] }
  0x6c   :  { %845 = vmatmul.mubr.f32.vlgmr.msra.gmra.mrb[2].mxu1 %v2382_v45  ;;  %1981 = vmatprep.subr.bf16.mxu0 %v1980_v38  ;;  %v1986_v45 = vpack.c.bf16 %v180_v57, %v179_v56  ;;  %v1998_v38 = vpack.c.bf16 %v186_v29, %v185_v28  ;;  %v2000_v40 = vpack.c.bf16 %v204_v35, %v203_v34  ;;  %v189_v57 = vld [vmem:[#allocation2 + $0x470] sm:$0xff]  ;;  %v242_v20 = vld [vmem:[#allocation2 + $0x618] sm:$0xff]  ;;  %v292_v28 = vld [vmem:[#allocation2 + $0x7a8] sm:$0xff] }
  0x6d   :  { %2011 = vmatpush3.bf16.msra.mxu1 %v2010_v36  ;;  %984 = vmatprep.mubr.f32.mxu1 %v494_v33  ;;  %v235_v36 = vld [vmem:[#allocation2 + $0x5e0] sm:$0xff]  ;;  %v2004_v56 = vpack.c.bf16 %v206_v49, %v205_v48  ;;  %v221_v33 = vld [vmem:[#allocation2 + $0x570] sm:$0xff]  ;;  %v274_v23 = vld [vmem:[#allocation2 + $0x718] sm:$0xff] }
  0x6e   :  { %2013 = vmatprep.subr.bf16.mxu1 %v2012_v44  ;;  %v219_v44 = vld [vmem:[#allocation2 + $0x560] sm:$0xff]  ;;  %v2032_v46 = vpack.c.bf16 %v236_v37, %v235_v36  ;;  %v244_v35 = vld [vmem:[#allocation2 + $0x628] sm:$0xff]  ;;  %v277_v48 = vld [vmem:[#allocation2 + $0x730] sm:$0xff] }
  0x6f   :  { %1983 = vmatpush3.bf16.msra.mxu0 %v1982_v53  ;;  %v2002_v53 = vpack.c.bf16 %v188_v43, %v187_v41  ;;  %v243_v34 = vld [vmem:[#allocation2 + $0x620] sm:$0xff]  ;;  %v294_v41 = vld [vmem:[#allocation2 + $0x7b8] sm:$0xff] }
  0x70   :  { %1985 = vmatprep.subr.bf16.mxu0 %v1984_v55  ;;  %v2034_v55 = vpack.c.bf16 %v220_v47, %v219_v44  ;;  %v275_v36 = vld [vmem:[#allocation2 + $0x720] sm:$0xff]  ;;  %v2050_v43 = vpack.c.bf16 %v244_v35, %v243_v34  ;;  %v246_v47 = vld [vmem:[#allocation2 + $0x638] sm:$0xff]  ;;  %v253_v34 = vld [vmem:[#allocation2 + $0x670] sm:$0xff] }
  0x71   :  { %2015 = vmatpush3.bf16.msra.mxu1 %v2014_v54  ;;  %v44_v54 = vld [vmem:[%s2460_s0 + $0x18] sm:$0xff] }
  0x72   :  { %2017 = vmatprep.subr.bf16.mxu1 %v2016_v59  ;;  %v2036_v59 = vpack.c.bf16 %v238_v51, %v237_v50  ;;  %v2405_v11 = vrot.slane %v44_v54, %v2366_v13  ;;  %v278_v50 = vld [vmem:[#allocation2 + $0x738] sm:$0xff]  ;;  %v263_v51 = vld [vmem:[#allocation2 + $0x6c0] sm:$0xff] }
  0x73   :  { %1987 = vmatpush3.bf16.msra.mxu0 %v1986_v45  ;;  %v495_v45 = vcombine.high %v44_v54, %v44_v54  ;;  %v295_v54 = vld [vmem:[#allocation2 + $0x7c0] sm:$0xff]  ;;  %v266_v0 = vld [vmem:[#allocation2 + $0x6d8] sm:$0xff] }
  0x74   :  { %1989 = vmatprep.subr.bf16.mxu0 %v1988_v2  ;;  %v2038_v2 = vpack.c.bf16 %v222_v60, %v221_v33  ;;  %v247_v33 = vld [vmem:[#allocation2 + $0x640] sm:$0xff]  ;;  %v2060_v4 = vpack.c.bf16 %v266_v0, %v265_v63  ;;  %v282_v9 = vld [vmem:[#allocation2 + $0x758] sm:$0xff]  ;;  %v337_v63 = vld [vmem:[#allocation2 + $0x910] sm:$0xff] }
  0x75   :  { %2019 = vmatpush3.bf16.msra.mxu1 %v2018_v1  ;;  %v2006_v1 = vpack.c.bf16 %v190_v58, %v189_v57  ;;  %v2086_v57 = vpack.c.bf16 %v278_v50, %v277_v48  ;;  %v279_v60 = vld [vmem:[#allocation2 + $0x740] sm:$0xff]  ;;  %v254_v35 = vld [vmem:[#allocation2 + $0x678] sm:$0xff]  ;;  %v304_v48 = vld [vmem:[#allocation2 + $0x808] sm:$0xff] }
  0x76   :  { %2021 = vmatprep.subr.bf16.mxu1 %v2020_v6  ;;  %v271_v6 = vld [vmem:[#allocation2 + $0x700] sm:$0xff] }
  0x77   :  { %1991 = vmatpush3.bf16.msra.mxu0 %v1990_v12  ;;  %v289_v12 = vld [vmem:[#allocation2 + $0x790] sm:$0xff]  ;;  %v2074_v17 = vpack.c.bf16 %v272_v8, %v271_v6  ;;  %v250_v6 = vld [vmem:[#allocation2 + $0x658] sm:$0xff] }
  0x78   :  { %1993 = vmatprep.subr.bf16.mxu0 %v1992_v15  ;;  %v2408_v15 = vrot.slane %v495_v45, %v2366_v13  ;;  %v297_v45 = vld [vmem:[#allocation2 + $0x7d0] sm:$0xff] }
  0x79   :  { %2023 = vmatpush3.bf16.msra.mxu1 %v2022_v14  ;;  %v290_v14 = vld [vmem:[#allocation2 + $0x798] sm:$0xff] }
  0x7a   :  { %2025 = vmatprep.subr.bf16.mxu1 %v2024_v19  ;;  %v241_v19 = vld [vmem:[#allocation2 + $0x610] sm:$0xff]  ;;  %v2076_v22 = vpack.c.bf16 %v290_v14, %v289_v12  ;;  %v511_v29 = vcombine.high %v2408_v15, %v2408_v15  ;;  %v268_v12 = vld [vmem:[#allocation2 + $0x6e8] sm:$0xff]  ;;  %v299_v14 = vld [vmem:[#allocation2 + $0x7e0] sm:$0xff] }
  0x7b   :  { %1995 = vmatpush3.bf16.msra.mxu0 %v1994_v25  ;;  %v260_v25 = vld [vmem:[#allocation2 + $0x6a8] sm:$0xff]  ;;  %v2046_v30 = vpack.c.bf16 %v242_v20, %v241_v19  ;;  %v2064_v19 = vpack.c.bf16 %v268_v12, %v267_v10  ;;  %v251_v20 = vld [vmem:[#allocation2 + $0x660] sm:$0xff] }
  0x7c   :  { %1997 = vmatprep.subr.bf16.mxu0 %v1996_v27  ;;  %v291_v27 = vld [vmem:[#allocation2 + $0x7a0] sm:$0xff]  ;;  %v2048_v32 = vpack.c.bf16 %v260_v25, %v259_v24  ;;  %v284_v24 = vld [vmem:[#allocation2 + $0x768] sm:$0xff]  ;;  %v269_v25 = vld [vmem:[#allocation2 + $0x6f0] sm:$0xff] }
  0x7d   :  { %2027 = vmatpush3.bf16.msra.mxu1 %v2026_v26  ;;  %v510_v26 = vcombine.high %v2405_v11, %v2405_v11  ;;  %v2080_v37 = vpack.c.bf16 %v292_v28, %v291_v27  ;;  %v301_v27 = vld [vmem:[#allocation2 + $0x7f0] sm:$0xff]  ;;  %v302_v28 = vld [vmem:[#allocation2 + $0x7f8] sm:$0xff]  ;;  %v307_v10 = vld [vmem:[#allocation2 + $0x820] sm:$0xff] }
  0x7e   :  { %2029 = vmatprep.subr.bf16.mxu1 %v2028_v31  ;;  %v2078_v31 = vpack.c.bf16 %v274_v23, %v273_v21  ;;  %v252_v21 = vld [vmem:[#allocation2 + $0x668] sm:$0xff] }
  0x7f   :  { %1999 = vmatpush3.bf16.msra.mxu0 %v1998_v38  ;;  %v276_v38 = vld [vmem:[#allocation2 + $0x728] sm:$0xff] }
  0x80   :  { %2001 = vmatprep.subr.bf16.mxu0 %v2000_v40  ;;  %v293_v40 = vld [vmem:[#allocation2 + $0x7b0] sm:$0xff]  ;;  %v308_v12 = vld [vmem:[#allocation2 + $0x828] sm:$0xff] }
  0x81   :  { %2031 = vmatpush3.bf16.msra.mxu1 %v2030_v39  ;;  %v262_v39 = vld [vmem:[#allocation2 + $0x6b8] sm:$0xff]  ;;  %v2084_v49 = vpack.c.bf16 %v294_v41, %v293_v40  ;;  %v351_v40 = vld [vmem:[#allocation2 + $0x980] sm:$0xff]  ;;  %v352_v41 = vld [vmem:[#allocation2 + $0x988] sm:$0xff] }
  0x82   :  { %2033 = vmatprep.subr.bf16.mxu1 %v2032_v46  ;;  %v245_v46 = vld [vmem:[#allocation2 + $0x630] sm:$0xff]  ;;  %v2136_v50 = vpack.c.bf16 %v352_v41, %v351_v40  ;;  %v330_v41 = vld [vmem:[#allocation2 + $0x8d8] sm:$0xff] }
  0x83   :  { %2003 = vmatpush3.bf16.msra.mxu0 %v2002_v53  ;;  %v264_v53 = vld [vmem:[#allocation2 + $0x6c8] sm:$0xff]  ;;  %v329_v40 = vld [vmem:[#allocation2 + $0x8d0] sm:$0xff] }
  0x84   :  { %2005 = vmatprep.subr.bf16.mxu0 %v2004_v56  ;;  %v2054_v56 = vpack.c.bf16 %v246_v47, %v245_v46  ;;  %v2056_v58 = vpack.c.bf16 %v264_v53, %v263_v51  ;;  %v303_v47 = vld [vmem:[#allocation2 + $0x800] sm:$0xff]  ;;  %v336_v51 = vld [vmem:[#allocation2 + $0x908] sm:$0xff]  ;;  %v321_v53 = vld [vmem:[#allocation2 + $0x890] sm:$0xff] }
  0x85   :  { %2035 = vmatpush3.bf16.msra.mxu1 %v2034_v55  ;;  %v296_v55 = vld [vmem:[#allocation2 + $0x7c8] sm:$0xff] }
  0x86   :  { %2037 = vmatprep.subr.bf16.mxu1 %v2036_v59  ;;  %v248_v59 = vld [vmem:[#allocation2 + $0x648] sm:$0xff]  ;;  %v2088_v61 = vpack.c.bf16 %v296_v55, %v295_v54  ;;  %v322_v54 = vld [vmem:[#allocation2 + $0x898] sm:$0xff] }
  0x87   :  { %2007 = vmatpush3.bf16.msra.mxu0 %v2006_v1  ;;  %v298_v1 = vld [vmem:[#allocation2 + $0x7d8] sm:$0xff] }
  0x88   :  { %2041 = vmatprep.subr.bf16.mxu0 %v2040_v3  ;;  %v2090_v3 = vpack.c.bf16 %v280_v62, %v279_v60  ;;  %v2092_v8 = vpack.c.bf16 %v298_v1, %v297_v45  ;;  %v2108_v60 = vpack.c.bf16 %v322_v54, %v321_v53  ;;  %v306_v62 = vld [vmem:[#allocation2 + $0x818] sm:$0xff]  ;;  %v323_v1 = vld [vmem:[#allocation2 + $0x8a0] sm:$0xff] }
  0x89   :  { %2039 = vmatpush3.bf16.msra.mxu1 %v2038_v2  ;;  %v2058_v2 = vpack.c.bf16 %v248_v59, %v247_v33  ;;  %v2106_v33 = vpack.c.bf16 %v304_v48, %v303_v47  ;;  %v338_v45 = vld [vmem:[#allocation2 + $0x918] sm:$0xff]  ;;  %v2124_v47 = vpack.c.bf16 %v330_v41, %v329_v40  ;;  %v313_v48 = vld [vmem:[#allocation2 + $0x850] sm:$0xff]  ;;  %v331_v54 = vld [vmem:[#allocation2 + $0x8e0] sm:$0xff] }
  0x8a   :  { %2073 = vmatprep.subr.bf16.mxu1 %v2072_v7  ;;  %915 = vmatmul.mubr.f32.vlgmr.msra.gmra.mrb[4].mxu0 %v2390_v42  ;;  %v261_v42 = vld [vmem:[#allocation2 + $0x6b0] sm:$0xff]  ;;  %v346_v53 = vld [vmem:[#allocation2 + $0x958] sm:$0xff] }
  0x8b   :  { %2043 = vmatpush3.bf16.msra.mxu0 %v2042_v16  ;;  %1054 = vmatprep.mubr.f32.mxu0 %v510_v26  ;;  %v2052_v44 = vpack.c.bf16 %v262_v39, %v261_v42  ;;  %v281_v7 = vld [vmem:[#allocation2 + $0x750] sm:$0xff]  ;;  %v300_v16 = vld [vmem:[#allocation2 + $0x7e8] sm:$0xff]  ;;  %v270_v26 = vld [vmem:[#allocation2 + $0x6f8] sm:$0xff] }
  0x8c   :  { %985 = vmatmul.mubr.f32.vlgmr.msra.gmra.mrb[4].mxu1 %v2396_v52  ;;  %2045 = vmatprep.subr.bf16.mxu0 %v2044_v18  ;;  %v2082_v52 = vpack.c.bf16 %v276_v38, %v275_v36  ;;  %v2094_v18 = vpack.c.bf16 %v282_v9, %v281_v7  ;;  %v2096_v23 = vpack.c.bf16 %v300_v16, %v299_v14  ;;  %v285_v36 = vld [vmem:[#allocation2 + $0x770] sm:$0xff]  ;;  %v286_v38 = vld [vmem:[#allocation2 + $0x778] sm:$0xff]  ;;  %v319_v42 = vld [vmem:[#allocation2 + $0x880] sm:$0xff] }
  0x8d   :  { %2075 = vmatpush3.bf16.msra.mxu1 %v2074_v17  ;;  %1124 = vmatprep.mubr.f32.mxu1 %v511_v29  ;;  %v2062_v17 = vpack.c.bf16 %v250_v6, %v249_v5  ;;  %v2066_v29 = vpack.c.bf16 %v252_v21, %v251_v20  ;;  %v320_v39 = vld [vmem:[#allocation2 + $0x888] sm:$0xff]  ;;  %v339_v14 = vld [vmem:[#allocation2 + $0x920] sm:$0xff]  ;;  %v358_v20 = vld [vmem:[#allocation2 + $0x9b8] sm:$0xff]  ;;  %v2114_v21 = vpack.c.bf16 %v308_v12, %v307_v10 }
  0x8e   :  { %2077 = vmatprep.subr.bf16.mxu1 %v2076_v22  ;;  %v283_v22 = vld [vmem:[#allocation2 + $0x760] sm:$0xff]  ;;  %v2104_v46 = vpack.c.bf16 %v320_v39, %v319_v42  ;;  %v356_v5 = vld [vmem:[#allocation2 + $0x9a8] sm:$0xff]  ;;  %v317_v10 = vld [vmem:[#allocation2 + $0x870] sm:$0xff] }
  0x8f   :  { %2047 = vmatpush3.bf16.msra.mxu0 %v2046_v30  ;;  %v45_v30 = vld [vmem:[%s2460_s0 + $0x20] sm:$0xff]  ;;  %v344_v39 = vld [vmem:[#allocation2 + $0x948] sm:$0xff]  ;;  %v318_v12 = vld [vmem:[#allocation2 + $0x878] sm:$0xff] }
  0x90   :  { %2049 = vmatprep.subr.bf16.mxu0 %v2048_v32  ;;  %v2068_v32 = vpack.c.bf16 %v270_v26, %v269_v25  ;;  %v2420_v55 = vrot.slane %v45_v30, %v2366_v13  ;;  %v341_v25 = vld [vmem:[#allocation2 + $0x930] sm:$0xff] }
  0x91   :  { %2079 = vmatpush3.bf16.msra.mxu1 %v2078_v31  ;;  %v2098_v31 = vpack.c.bf16 %v284_v24, %v283_v22  ;;  %v310_v24 = vld [vmem:[#allocation2 + $0x838] sm:$0xff]  ;;  %v401_v40 = vld [vmem:[#allocation2 + $0xb10] sm:$0xff] }
  0x92   :  { %2081 = vmatprep.subr.bf16.mxu1 %v2080_v37  ;;  %v2100_v37 = vpack.c.bf16 %v302_v28, %v301_v27  ;;  %v342_v27 = vld [vmem:[#allocation2 + $0x938] sm:$0xff]  ;;  %v327_v28 = vld [vmem:[#allocation2 + $0x8c0] sm:$0xff] }
  0x93   :  { %2051 = vmatpush3.bf16.msra.mxu0 %v2050_v43  ;;  %v512_v43 = vcombine.high %v45_v30, %v45_v30  ;;  %v359_v30 = vld [vmem:[#allocation2 + $0x9c0] sm:$0xff] }
  0x94   :  { %2053 = vmatprep.subr.bf16.mxu0 %v2052_v44  ;;  %v2102_v44 = vpack.c.bf16 %v286_v38, %v285_v36  ;;  %v311_v36 = vld [vmem:[#allocation2 + $0x840] sm:$0xff] }
  0x95   :  { %2083 = vmatpush3.bf16.msra.mxu1 %v2082_v52  ;;  %v2070_v52 = vpack.c.bf16 %v254_v35, %v253_v34  ;;  %v2150_v34 = vpack.c.bf16 %v342_v27, %v341_v25  ;;  %v343_v38 = vld [vmem:[#allocation2 + $0x940] sm:$0xff]  ;;  %v368_v25 = vld [vmem:[#allocation2 + $0xa08] sm:$0xff] }
  0x96   :  { %2085 = vmatprep.subr.bf16.mxu1 %v2084_v49  ;;  %v335_v49 = vld [vmem:[#allocation2 + $0x900] sm:$0xff] }
  0x97   :  { %2055 = vmatpush3.bf16.msra.mxu0 %v2054_v56  ;;  %v353_v56 = vld [vmem:[#allocation2 + $0x990] sm:$0xff]  ;;  %v2138_v59 = vpack.c.bf16 %v336_v51, %v335_v49  ;;  %v314_v49 = vld [vmem:[#allocation2 + $0x858] sm:$0xff] }
  0x98   :  { %2057 = vmatprep.subr.bf16.mxu0 %v2056_v58  ;;  %v2423_v58 = vrot.slane %v512_v43, %v2366_v13  ;;  %v361_v43 = vld [vmem:[#allocation2 + $0x9d0] sm:$0xff] }
  0x99   :  { %2087 = vmatpush3.bf16.msra.mxu1 %v2086_v57  ;;  %v354_v57 = vld [vmem:[#allocation2 + $0x998] sm:$0xff] }
  0x9a   :  { %2089 = vmatprep.subr.bf16.mxu1 %v2088_v61  ;;  %v305_v61 = vld [vmem:[#allocation2 + $0x810] sm:$0xff]  ;;  %v2140_v0 = vpack.c.bf16 %v354_v57, %v353_v56  ;;  %v528_v6 = vcombine.high %v2423_v58, %v2423_v58  ;;  %v332_v56 = vld [vmem:[#allocation2 + $0x8e8] sm:$0xff]  ;;  %v363_v57 = vld [vmem:[#allocation2 + $0x9e0] sm:$0xff] }
  0x9b   :  { %2059 = vmatpush3.bf16.msra.mxu0 %v2058_v2  ;;  %v324_v2 = vld [vmem:[#allocation2 + $0x8a8] sm:$0xff]  ;;  %v2110_v7 = vpack.c.bf16 %v306_v62, %v305_v61  ;;  %v2128_v61 = vpack.c.bf16 %v332_v56, %v331_v54  ;;  %v315_v62 = vld [vmem:[#allocation2 + $0x860] sm:$0xff] }
  0x9c   :  { %2061 = vmatprep.subr.bf16.mxu0 %v2060_v4  ;;  %v355_v4 = vld [vmem:[#allocation2 + $0x9a0] sm:$0xff]  ;;  %v2112_v9 = vpack.c.bf16 %v324_v2, %v323_v1  ;;  %v348_v1 = vld [vmem:[#allocation2 + $0x968] sm:$0xff]  ;;  %v333_v2 = vld [vmem:[#allocation2 + $0x8f0] sm:$0xff] }
  0x9d   :  { %2091 = vmatpush3.bf16.msra.mxu1 %v2090_v3  ;;  %v527_v3 = vcombine.high %v2420_v55, %v2420_v55  ;;  %v2144_v16 = vpack.c.bf16 %v356_v5, %v355_v4  ;;  %v365_v4 = vld [vmem:[#allocation2 + $0x9f0] sm:$0xff]  ;;  %v366_v5 = vld [vmem:[#allocation2 + $0x9f8] sm:$0xff]  ;;  %v372_v54 = vld [vmem:[#allocation2 + $0xa28] sm:$0xff] }
  0x9e   :  { %2093 = vmatprep.subr.bf16.mxu1 %v2092_v8  ;;  %v2142_v8 = vpack.c.bf16 %v338_v45, %v337_v63  ;;  %v316_v63 = vld [vmem:[#allocation2 + $0x868] sm:$0xff]  ;;  %v403_v56 = vld [vmem:[#allocation2 + $0xb20] sm:$0xff] }
  0x9f   :  { %2063 = vmatpush3.bf16.msra.mxu0 %v2062_v17  ;;  %v340_v17 = vld [vmem:[#allocation2 + $0x928] sm:$0xff] }
  0xa0   :  { %2065 = vmatprep.subr.bf16.mxu0 %v2064_v19  ;;  %v357_v19 = vld [vmem:[#allocation2 + $0x9b0] sm:$0xff] }
  0xa1   :  { %2095 = vmatpush3.bf16.msra.mxu1 %v2094_v18  ;;  %v326_v18 = vld [vmem:[#allocation2 + $0x8b8] sm:$0xff]  ;;  %v2148_v26 = vpack.c.bf16 %v358_v20, %v357_v19  ;;  %v415_v19 = vld [vmem:[#allocation2 + $0xb80] sm:$0xff]  ;;  %v416_v20 = vld [vmem:[#allocation2 + $0xb88] sm:$0xff] }
  0xa2   :  { %2097 = vmatprep.subr.bf16.mxu1 %v2096_v23  ;;  %v309_v23 = vld [vmem:[#allocation2 + $0x830] sm:$0xff]  ;;  %v2200_v27 = vpack.c.bf16 %v416_v20, %v415_v19  ;;  %v394_v19 = vld [vmem:[#allocation2 + $0xad8] sm:$0xff] }
  0xa3   :  { %2067 = vmatpush3.bf16.msra.mxu0 %v2066_v29  ;;  %v328_v29 = vld [vmem:[#allocation2 + $0x8c8] sm:$0xff]  ;;  %v425_v20 = vld [vmem:[#allocation2 + $0xbd0] sm:$0xff] }
  0xa4   :  { %2069 = vmatprep.subr.bf16.mxu0 %v2068_v32  ;;  %v2118_v32 = vpack.c.bf16 %v310_v24, %v309_v23  ;;  %v2120_v35 = vpack.c.bf16 %v328_v29, %v327_v28  ;;  %v367_v24 = vld [vmem:[#allocation2 + $0xa00] sm:$0xff]  ;;  %v400_v28 = vld [vmem:[#allocation2 + $0xb08] sm:$0xff]  ;;  %v385_v29 = vld [vmem:[#allocation2 + $0xa90] sm:$0xff] }
  0xa5   :  { %2099 = vmatpush3.bf16.msra.mxu1 %v2098_v31  ;;  %v360_v31 = vld [vmem:[#allocation2 + $0x9c8] sm:$0xff] }
  0xa6   :  { %2101 = vmatprep.subr.bf16.mxu1 %v2100_v37  ;;  %v312_v37 = vld [vmem:[#allocation2 + $0x848] sm:$0xff]  ;;  %v2152_v42 = vpack.c.bf16 %v360_v31, %v359_v30  ;;  %v386_v30 = vld [vmem:[#allocation2 + $0xa98] sm:$0xff] }
  0xa7   :  { %2071 = vmatpush3.bf16.msra.mxu0 %v2070_v52  ;;  %v362_v52 = vld [vmem:[#allocation2 + $0x9d8] sm:$0xff] }
  0xa8   :  { %2105 = vmatprep.subr.bf16.mxu0 %v2104_v46  ;;  %v2154_v46 = vpack.c.bf16 %v344_v39, %v343_v38  ;;  %v2156_v51 = vpack.c.bf16 %v362_v52, %v361_v43  ;;  %v2172_v38 = vpack.c.bf16 %v386_v30, %v385_v29  ;;  %v370_v39 = vld [vmem:[#allocation2 + $0xa18] sm:$0xff]  ;;  %v387_v52 = vld [vmem:[#allocation2 + $0xaa0] sm:$0xff]  ;;  %v396_v30 = vld [vmem:[#allocation2 + $0xae8] sm:$0xff] }
  0xa9   :  { %2103 = vmatpush3.bf16.msra.mxu1 %v2102_v44  ;;  %v2122_v44 = vpack.c.bf16 %v312_v37, %v311_v36  ;;  %v2170_v36 = vpack.c.bf16 %v368_v25, %v367_v24  ;;  %v402_v43 = vld [vmem:[#allocation2 + $0xb18] sm:$0xff]  ;;  %v377_v24 = vld [vmem:[#allocation2 + $0xa50] sm:$0xff]  ;;  %v395_v29 = vld [vmem:[#allocation2 + $0xae0] sm:$0xff] }
  0xaa   :  { %2137 = vmatprep.subr.bf16.mxu1 %v2136_v50  ;;  %1055 = vmatmul.mubr.f32.vlgmr.msra.gmra.mrb[6].mxu0 %v2405_v11  ;;  %v325_v11 = vld [vmem:[#allocation2 + $0x8b0] sm:$0xff]  ;;  %v378_v25 = vld [vmem:[#allocation2 + $0xa58] sm:$0xff] }
  0xab   :  { %2107 = vmatpush3.bf16.msra.mxu0 %v2106_v33  ;;  %1194 = vmatprep.mubr.f32.mxu0 %v527_v3  ;;  %v2116_v22 = vpack.c.bf16 %v326_v18, %v325_v11  ;;  %v345_v50 = vld [vmem:[#allocation2 + $0x950] sm:$0xff]  ;;  %v364_v33 = vld [vmem:[#allocation2 + $0x9e8] sm:$0xff]  ;;  %v334_v3 = vld [vmem:[#allocation2 + $0x8f8] sm:$0xff] }
  0xac   :  { %1125 = vmatmul.mubr.f32.vlgmr.msra.gmra.mrb[6].mxu1 %v2408_v15  ;;  %2109 = vmatprep.subr.bf16.mxu0 %v2108_v60  ;;  %v2146_v15 = vpack.c.bf16 %v340_v17, %v339_v14  ;;  %v2158_v60 = vpack.c.bf16 %v346_v53, %v345_v50  ;;  %v2160_v45 = vpack.c.bf16 %v364_v33, %v363_v57  ;;  %v349_v14 = vld [vmem:[#allocation2 + $0x970] sm:$0xff]  ;;  %v350_v17 = vld [vmem:[#allocation2 + $0x978] sm:$0xff]  ;;  %v383_v11 = vld [vmem:[#allocation2 + $0xa80] sm:$0xff] }
  0xad   :  { %2139 = vmatpush3.bf16.msra.mxu1 %v2138_v59  ;;  %1264 = vmatprep.mubr.f32.mxu1 %v528_v6  ;;  %v2126_v59 = vpack.c.bf16 %v314_v49, %v313_v48  ;;  %v2130_v6 = vpack.c.bf16 %v316_v63, %v315_v62  ;;  %v384_v18 = vld [vmem:[#allocation2 + $0xa88] sm:$0xff]  ;;  %v2206_v50 = vpack.c.bf16 %v402_v43, %v401_v40  ;;  %v371_v53 = vld [vmem:[#allocation2 + $0xa20] sm:$0xff] }
  0xae   :  { %2141 = vmatprep.subr.bf16.mxu1 %v2140_v0  ;;  %v347_v0 = vld [vmem:[#allocation2 + $0x960] sm:$0xff]  ;;  %v2168_v23 = vpack.c.bf16 %v384_v18, %v383_v11  ;;  %v404_v33 = vld [vmem:[#allocation2 + $0xb28] sm:$0xff]  ;;  %v2178_v62 = vpack.c.bf16 %v372_v54, %v371_v53  ;;  %v393_v18 = vld [vmem:[#allocation2 + $0xad0] sm:$0xff] }
  0xaf   :  { %2111 = vmatpush3.bf16.msra.mxu0 %v2110_v7  ;;  %v46_v7 = vld [vmem:[%s2460_s0 + $0x28] sm:$0xff]  ;;  %v411_v40 = vld [vmem:[#allocation2 + $0xb60] sm:$0xff]  ;;  %v413_v54 = vld [vmem:[#allocation2 + $0xb70] sm:$0xff]  ;;  %s2321_s0 = smov [#allocation7]  }
  0xb0   :  { %2113 = vmatprep.subr.bf16.mxu0 %v2112_v9  ;;  %v2132_v9 = vpack.c.bf16 %v334_v3, %v333_v2  ;;  %v2435_v31 = vrot.slane %v46_v7, %v2366_v13  ;;  %v406_v3 = vld [vmem:[#allocation2 + $0xb38] sm:$0xff]  ;;  %v408_v11 = vld [vmem:[#allocation2 + $0xb48] sm:$0xff]  ;;  %s1417_s22 = sshll.u32 %s2321_s0, 4  ;;  %s1418_s22 = int_to_ptr.vmem [resolvable:$true] %s1417_s22 }
  0xb1   :  { %2143 = vmatpush3.bf16.msra.mxu1 %v2142_v8  ;;  %v2162_v8 = vpack.c.bf16 %v348_v1, %v347_v0  ;;  %v373_v0 = vld [vmem:[#allocation2 + $0xa30] sm:$0xff]  ;;  %v412_v43 = vld [vmem:[#allocation2 + $0xb68] sm:$0xff]  ;;  %s2288_s23 = scalar_lea.vmem %s1418_s22, 32  ;;  %p2293_p3 = scmp.lt.s32.totalorder %s1418_s22, %s1418_s22 }
  0xb2   :  { %2145 = vmatprep.subr.bf16.mxu1 %v2144_v16  ;;  %v2164_v16 = vpack.c.bf16 %v366_v5, %v365_v4  ;;  %v405_v1 = vld [vmem:[#allocation2 + $0xb30] sm:$0xff]  ;;  %v391_v4 = vld [vmem:[#allocation2 + $0xac0] sm:$0xff]  ;;  %v392_v5 = vld [vmem:[#allocation2 + $0xac8] sm:$0xff]  ;;  %p2289_p2 = scmp.ne.s32.totalorder %s1418_s22, %s2288_s23  ;;  %p2294_p4 = scmp.lt.s32.totalorder %s2288_s23, %s2288_s23 }
  0xb3   :  { %2115 = vmatpush3.bf16.msra.mxu0 %v2114_v21  ;;  %v529_v21 = vcombine.high %v46_v7, %v46_v7  ;;  %v424_v7 = vld [vmem:[#allocation2 + $0xbc8] sm:$0xff] }
  0xb4   :  { %2117 = vmatprep.subr.bf16.mxu0 %v2116_v22  ;;  %v2166_v22 = vpack.c.bf16 %v350_v17, %v349_v14  ;;  %v376_v14 = vld [vmem:[#allocation2 + $0xa48] sm:$0xff]  ;;  %p2295_p5 = por %p2294_p4, %p2293_p3 }
  0xb5   :  { %2147 = vmatpush3.bf16.msra.mxu1 %v2146_v15  ;;  %v2134_v15 = vpack.c.bf16 %v318_v12, %v317_v10  ;;  %v2184_v10 = vpack.c.bf16 %v392_v5, %v391_v4  ;;  %v375_v12 = vld [vmem:[#allocation2 + $0xa40] sm:$0xff] }
  0xb6   :  { %2149 = vmatprep.subr.bf16.mxu1 %v2148_v26  ;;  %v399_v26 = vld [vmem:[#allocation2 + $0xb00] sm:$0xff]  ;;  %p2296_p6 = pnand %p2295_p5, %p2289_p2 }
  0xb7   :  { %2119 = vmatpush3.bf16.msra.mxu0 %v2118_v32  ;;  %v417_v32 = vld [vmem:[#allocation2 + $0xb90] sm:$0xff]  ;;  %v2202_v37 = vpack.c.bf16 %v400_v28, %v399_v26  ;;  %v410_v28 = vld [vmem:[#allocation2 + $0xb58] sm:$0xff] }
  0xb8   :  { %2121 = vmatprep.subr.bf16.mxu0 %v2120_v35  ;;  %v2438_v35 = vrot.slane %v529_v21, %v2366_v13  ;;  %v419_v13 = vld [vmem:[#allocation2 + $0xba0] sm:$0xff]  ;;  %v426_v21 = vld [vmem:[#allocation2 + $0xbd8] sm:$0xff]  ;;  %v409_v26 = vld [vmem:[#allocation2 + $0xb50] sm:$0xff] }
  0xb9   :  { %2151 = vmatpush3.bf16.msra.mxu1 %v2150_v34  ;;  %v418_v34 = vld [vmem:[#allocation2 + $0xb98] sm:$0xff] }
  0xba   :  { %2153 = vmatprep.subr.bf16.mxu1 %v2152_v42  ;;  %v369_v42 = vld [vmem:[#allocation2 + $0xa10] sm:$0xff]  ;;  %v2204_v41 = vpack.c.bf16 %v418_v34, %v417_v32  ;;  %v545_v48 = vcombine.high %v2438_v35, %v2438_v35  ;;  %v427_v32 = vld [vmem:[#allocation2 + $0xbe0] sm:$0xff]  ;;  %v428_v34 = vld [vmem:[#allocation2 + $0xbe8] sm:$0xff] }
  0xbb   :  { %2123 = vmatpush3.bf16.msra.mxu0 %v2122_v44  ;;  %v388_v44 = vld [vmem:[#allocation2 + $0xaa8] sm:$0xff]  ;;  %v2174_v49 = vpack.c.bf16 %v370_v39, %v369_v42  ;;  %v379_v42 = vld [vmem:[#allocation2 + $0xa60] sm:$0xff] }
  0xbc   :  { %2125 = vmatprep.subr.bf16.mxu0 %v2124_v47  ;;  %v420_v47 = vld [vmem:[#allocation2 + $0xba8] sm:$0xff] }
  0xbd   :  { %2155 = vmatpush3.bf16.msra.mxu1 %v2154_v46  ;;  %v544_v46 = vcombine.high %v2435_v31, %v2435_v31  ;;  %v2208_v57 = vpack.c.bf16 %v420_v47, %v419_v13  ;;  %v380_v39 = vld [vmem:[#allocation2 + $0xa68] sm:$0xff]  ;;  %v430_v13 = vld [vmem:[#allocation2 + $0xbf8] sm:$0xff] }
  0xbe   :  { %2157 = vmatprep.subr.bf16.mxu1 %v2156_v51  ;;  %v2176_v51 = vpack.c.bf16 %v388_v44, %v387_v52  ;;  %v397_v52 = vld [vmem:[#allocation2 + $0xaf0] sm:$0xff]  ;;  %v398_v44 = vld [vmem:[#allocation2 + $0xaf8] sm:$0xff]  ;;  %v2194_v47 = vpack.c.bf16 %v380_v39, %v379_v42 }
  0xbf   :  { %2127 = vmatpush3.bf16.msra.mxu0 %v2126_v59  ;;  %v390_v59 = vld [vmem:[#allocation2 + $0xab8] sm:$0xff] }
  0xc0   :  { %2129 = vmatprep.subr.bf16.mxu0 %v2128_v61  ;;  %v422_v61 = vld [vmem:[#allocation2 + $0xbb8] sm:$0xff] }
  0xc1   :  { %2159 = vmatpush3.bf16.msra.mxu1 %v2158_v60  ;;  %v421_v60 = vld [vmem:[#allocation2 + $0xbb0] sm:$0xff] }
  0xc2   :  { %2161 = vmatprep.subr.bf16.mxu1 %v2160_v45  ;;  %v374_v45 = vld [vmem:[#allocation2 + $0xa38] sm:$0xff]  ;;  %v2212_v2 = vpack.c.bf16 %v422_v61, %v421_v60 }
  0xc3   :  { %2131 = vmatpush3.bf16.msra.mxu0 %v2130_v6  ;;  %v423_v6 = vld [vmem:[#allocation2 + $0xbc0] sm:$0xff] }
  0xc4   :  { %2133 = vmatprep.subr.bf16.mxu0 %v2132_v9  ;;  %v2214_v9 = vpack.c.bf16 %v406_v3, %v405_v1  ;;  %v2216_v17 = vpack.c.bf16 %v424_v7, %v423_v6 }
  0xc5   :  { %2163 = vmatpush3.bf16.msra.mxu1 %v2162_v8  ;;  %v2182_v8 = vpack.c.bf16 %v374_v45, %v373_v0 }
  0xc6   :  { %2165 = vmatprep.subr.bf16.mxu1 %v2164_v16  ;;  %v407_v16 = vld [vmem:[#allocation2 + $0xb40] sm:$0xff] }
  0xc7   :  { %2135 = vmatpush3.bf16.msra.mxu0 %v2134_v15  ;;  %v2186_v15 = vpack.c.bf16 %v376_v14, %v375_v12 }
  0xc8   :  { %2169 = vmatprep.subr.bf16.mxu0 %v2168_v23  ;;  %v2188_v23 = vpack.c.bf16 %v394_v19, %v393_v18 }
  0xc9   :  { %2167 = vmatpush3.bf16.msra.mxu1 %v2166_v22  ;;  %v2218_v22 = vpack.c.bf16 %v408_v11, %v407_v16 }
  0xca   :  { %2201 = vmatprep.subr.bf16.mxu1 %v2200_v27  ;;  %1195 = vmatmul.mubr.f32.vlgmr.msra.gmra.mrb[8].mxu0 %v2420_v55  ;;  %v389_v55 = vld [vmem:[#allocation2 + $0xab0] sm:$0xff]  ;;  %v2220_v27 = vpack.c.bf16 %v426_v21, %v425_v20 }
  0xcb   :  { %2171 = vmatpush3.bf16.msra.mxu0 %v2170_v36  ;;  %1334 = vmatprep.mubr.f32.mxu0 %v544_v46  ;;  %v2180_v63 = vpack.c.bf16 %v390_v59, %v389_v55  ;;  %v2190_v36 = vpack.c.bf16 %v378_v25, %v377_v24  ;;  %v429_v46 = vld [vmem:[#allocation2 + $0xbf0] sm:$0xff]  ;;  %v1427_v59 = vld [vmem:[#allocation5] ss:$0 sm:$0xff] }
  0xcc   :  { %1265 = vmatmul.mubr.f32.vlgmr.msra.gmra.mrb[8].mxu1 %v2423_v58  ;;  %2173 = vmatprep.subr.bf16.mxu0 %v2172_v38  ;;  %v2210_v58 = vpack.c.bf16 %v404_v33, %v403_v56  ;;  %v2192_v38 = vpack.c.bf16 %v396_v30, %v395_v29  ;;  %v2228_v53 = vpack.c.bf16 %v430_v13, %v429_v46  ;;  %v414_v56 = vld [vmem:[#allocation2 + $0xb78] sm:$0xff] }
  0xcd   :  { %2203 = vmatpush3.bf16.msra.mxu1 %v2202_v37  ;;  %1404 = vmatprep.mubr.f32.mxu1 %v545_v48  ;;  %v2222_v37 = vpack.c.bf16 %v410_v28, %v409_v26  ;;  %v2226_v48 = vpack.c.bf16 %v412_v43, %v411_v40  ;;  %v2230_v33 = vpack.c.bf16 %v414_v56, %v413_v54 }
  0xce   :  { %2205 = vmatprep.subr.bf16.mxu1 %v2204_v41  ;;  %v2224_v41 = vpack.c.bf16 %v428_v34, %v427_v32 }
  0xcf   :  { %2175 = vmatpush3.bf16.msra.mxu0 %v2174_v49  ;;  %v2196_v49 = vpack.c.bf16 %v398_v44, %v397_v52 }
  0xd0   :  { %2177 = vmatprep.subr.bf16.mxu0 %v2176_v51  ;;  %v382_v51 = vld [vmem:[#allocation2 + $0xa78] sm:$0xff] }
  0xd1   :  { %2207 = vmatpush3.bf16.msra.mxu1 %v2206_v50  ;;  %v381_v50 = vld [vmem:[#allocation2 + $0xa70] sm:$0xff] }
  0xd2   :  { %2209 = vmatprep.subr.bf16.mxu1 %v2208_v57  ;;  %v2198_v57 = vpack.c.bf16 %v382_v51, %v381_v50 }
  0xd3   :  { %2179 = vmatpush3.bf16.msra.mxu0 %v2178_v62 }
  0xd4   :  { %2181 = vmatprep.subr.bf16.mxu0 %v2180_v63 }
  0xd5   :  { %2211 = vmatpush3.bf16.msra.mxu1 %v2210_v58 }
  0xd6   :  { %2213 = vmatprep.subr.bf16.mxu1 %v2212_v2 }
  0xd7   :  { %2183 = vmatpush3.bf16.msra.mxu0 %v2182_v8 }
  0xd8   :  { %2185 = vmatprep.subr.bf16.mxu0 %v2184_v10 }
  0xd9   :  { %2215 = vmatpush3.bf16.msra.mxu1 %v2214_v9 }
  0xda   :  { %2217 = vmatprep.subr.bf16.mxu1 %v2216_v17 }
  0xdb   :  { %2187 = vmatpush3.bf16.msra.mxu0 %v2186_v15 }
  0xdc   :  { %2189 = vmatprep.subr.bf16.mxu0 %v2188_v23 }
  0xdd   :  { %2219 = vmatpush3.bf16.msra.mxu1 %v2218_v22 }
  0xde   :  { %2221 = vmatprep.subr.bf16.mxu1 %v2220_v27 }
  0xdf   :  { %2191 = vmatpush3.bf16.msra.mxu0 %v2190_v36 }
  0xe0   :  { %2193 = vmatprep.subr.bf16.mxu0 %v2192_v38 }
  0xe1   :  { %2223 = vmatpush3.bf16.msra.mxu1 %v2222_v37 }
  0xe2   :  { %2225 = vmatprep.subr.bf16.mxu1 %v2224_v41 }
  0xe3   :  { %2195 = vmatpush3.bf16.msra.mxu0 %v2194_v47 }
  0xe4   :  { %2197 = vmatprep.subr.bf16.mxu0 %v2196_v49 }
  0xe5   :  { %2227 = vmatpush3.bf16.msra.mxu1 %v2226_v48 }
  0xe6   :  { %2229 = vmatprep.subr.bf16.mxu1 %v2228_v53 }
  0xe7   :  { %2199 = vmatpush3.bf16.msra.mxu0 %v2198_v57 }
  0xe9   :  { %2231 = vmatpush3.bf16.msra.mxu1 %v2230_v33 }
  0xea   :  { %1335 = vmatmul.mubr.f32.vlgmr.msra.gmra.mrb[10].mxu0 %v2435_v31 }
  0xec   :  { %1405 = vmatmul.mubr.f32.vlgmr.msra.gmra.mrb[10].mxu1 %v2438_v35 }
 0x11d   :  { %v1460_v55 = vpop.f32.mrb[0].mxu0 }
 0x11e   :  { %v1461_v60 = vpop.f32.mrb[1].mxu0 }
 0x11f   :  { %v1495_v61 = vpop.f32.mrb[0].mxu1  ;;  %v1462_v62 = vadd.f32 %v1461_v60, %v1460_v55 }
 0x120   :  { %v1496_v58 = vpop.f32.mrb[1].mxu1 }
 0x121   :  { %v1497_v63 = vadd.f32 %v1496_v58, %v1495_v61  ;;  %v637_v0 = vadd.f32 %v1462_v62, %v1427_v59 }
 0x123   :  { %v707_v45 = vadd.f32 %v1497_v63, %v637_v0 }
 0x13d   :  { %v1530_v1 = vpop.f32.mrb[2].mxu0 }
 0x13e   :  { %v1531_v2 = vpop.f32.mrb[3].mxu0 }
 0x13f   :  { %v1565_v3 = vpop.f32.mrb[2].mxu1  ;;  %v1532_v4 = vadd.f32 %v1531_v2, %v1530_v1 }
 0x140   :  { %v1566_v5 = vpop.f32.mrb[3].mxu1 }
 0x141   :  { %v1567_v6 = vadd.f32 %v1566_v5, %v1565_v3  ;;  %v777_v7 = vadd.f32 %v1532_v4, %v707_v45 }
 0x143   :  { %v847_v8 = vadd.f32 %v1567_v6, %v777_v7 }
 0x15d   :  { %v1600_v31 = vpop.f32.mrb[4].mxu0 }
 0x15e   :  { %v1601_v9 = vpop.f32.mrb[5].mxu0 }
 0x15f   :  { %v1635_v35 = vpop.f32.mrb[4].mxu1  ;;  %v1602_v10 = vadd.f32 %v1601_v9, %v1600_v31 }
 0x160   :  { %v1636_v12 = vpop.f32.mrb[5].mxu1 }
 0x161   :  { %v1637_v14 = vadd.f32 %v1636_v12, %v1635_v35  ;;  %v917_v16 = vadd.f32 %v1602_v10, %v847_v8 }
 0x163   :  { %v987_v17 = vadd.f32 %v1637_v14, %v917_v16 }
 0x17d   :  { %v1670_v11 = vpop.f32.mrb[6].mxu0 }
 0x17e   :  { %v1671_v18 = vpop.f32.mrb[7].mxu0 }
 0x17f   :  { %v1705_v19 = vpop.f32.mrb[6].mxu1  ;;  %v1672_v20 = vadd.f32 %v1671_v18, %v1670_v11 }
 0x180   :  { %v1706_v21 = vpop.f32.mrb[7].mxu1 }
 0x181   :  { %v1707_v15 = vadd.f32 %v1706_v21, %v1705_v19  ;;  %v1057_v22 = vadd.f32 %v1672_v20, %v987_v17 }
 0x183   :  { %v1127_v23 = vadd.f32 %v1707_v15, %v1057_v22 }
 0x19d   :  { %v1740_v24 = vpop.f32.mrb[8].mxu0 }
 0x19e   :  { %v1741_v25 = vpop.f32.mrb[9].mxu0 }
 0x19f   :  { %v1775_v26 = vpop.f32.mrb[8].mxu1  ;;  %v1742_v27 = vadd.f32 %v1741_v25, %v1740_v24 }
 0x1a0   :  { %v1776_v28 = vpop.f32.mrb[9].mxu1 }
 0x1a1   :  { %v1777_v29 = vadd.f32 %v1776_v28, %v1775_v26  ;;  %v1197_v30 = vadd.f32 %v1742_v27, %v1127_v23 }
 0x1a3   :  { %v1267_v32 = vadd.f32 %v1777_v29, %v1197_v30 }
 0x1bd   :  { %v1810_v34 = vpop.f32.mrb[10].mxu0 }
 0x1be   :  { %v1811_v36 = vpop.f32.mrb[11].mxu0 }
 0x1bf   :  { %v1845_v37 = vpop.f32.mrb[10].mxu1  ;;  %v1812_v38 = vadd.f32 %v1811_v36, %v1810_v34 }
 0x1c0   :  { %v1846_v42 = vpop.f32.mrb[11].mxu1 }
 0x1c1   :  { %v1847_v39 = vadd.f32 %v1846_v42, %v1845_v37  ;;  %v1337_v40 = vadd.f32 %v1812_v38, %v1267_v32 }
 0x1c3   :  { %v1407_v41 = vadd.f32 %v1847_v39, %v1337_v40 }
 0x1c5   :  { %1410 = vst [vmem:[#allocation7] sm:$0x3] %v1407_v41 }
 0x1c6   :  { %2299 = shalt.err (!%p2296_p6)
}
 0x1c7   :  { %s2300_s26 = scalar_lea.hbm %s2463_s3, 32 }
 0x1c8   :  { %p2301_p7 = scmp.ne.s32.totalorder %s2463_s3, %s2300_s26  ;;  %p2304_p8 = scmp.lt.u32.totalorder %s2300_s26, %s2463_s3 }
 0x1ca   :  { %p2306_p9 = pnand %p2304_p8, %p2301_p7 }
 0x1cc   :  { %2309 = shalt.err (!%p2306_p9)
}
 0x1cd   :  { %1420 = dma.vmem_to_hbm [thread:$0]  %s1418_s22, 32, %s2463_s3, [#allocation4]  }
 0x1ce   :  { %2314 = dma.done.wait [#allocation4], 32  }
 0x1cf   :  { %2315 = vsyncadd [#allocation4], 4294967264 }
 0x1d0   :  { %1424 = vsyncpa [#allocation3], 1 }
 0x1d1   :  { %1425 = vsyncpa [#allocation6], 1 }
 0x1d2   :  { %1426 = vsyncpa [#allocation4], 1 }

</bundles_post_ra>
